<compile_context>
chip_gen: v6e
topology: v6e:2x2x1
jax: 0.10.0
libtpu: 0.0.40
codegen_flags: <defaults>
</compile_context>

<pallas_src>
import math

import jax
import jax.numpy as jnp
import numpy as np
from jax.experimental import pallas as pl
from jax.experimental.pallas import tpu as pltpu


def _round_up(x, m):
    return ((x + m - 1) // m) * m


def wine_side_fusion_kernel(base_ref, side_ref,
                            wqfc_ref, bq_ref,
                            wskv_ref, bskv_ref,
                            wfca_ref, bfc_ref,
                            out_ref):
    TB, D = base_ref.shape
    S = side_ref.shape[0]

    base = base_ref[...].astype(jnp.bfloat16)              # (TB, D)   in-kernel cast
    side2d = side_ref[...].reshape(S * TB, side_ref.shape[-1])  # (S*TB, Dsp) bf16, free merge

    # Fused base projection: [q*scale | fc_base] = base @ [w_q*scale | w_fc_base]
    qf = jnp.dot(base, wqfc_ref[...], preferred_element_type=jnp.float32)    # (TB, D+F)
    q = qf[:, :D] + bq_ref[...]                              # (TB, D) f32, scale pre-folded
    fc_base = qf[:, D:]                                      # (TB, F) f32 partial fc

    # Fused K/V projection (side_proj folded in): (S*TB, 2D) f32
    kv = jnp.dot(side2d, wskv_ref[...], preferred_element_type=jnp.float32) + bskv_ref[...]

    # Single-head, query-length-1 attention over the S side tokens, fully unrolled.
    # VPU multiplies + XLU lane reduces + EUP exp/recip; keeps the MXU slot free.
    scores = [jnp.sum(q * kv[s * TB:(s + 1) * TB, :D], axis=-1, keepdims=True)
              for s in range(S)]                             # S x (TB, 1)
    m = scores[0]
    for s in range(1, S):
        m = jnp.maximum(m, scores[s])
    exps = [jnp.exp(sc - m) for sc in scores]
    denom = exps[0]
    for s in range(1, S):
        denom = denom + exps[s]
    inv = pl.reciprocal(denom, approx=True)                  # (TB, 1)

    ctx = (exps[0] * inv) * kv[0:TB, D:]
    for s in range(1, S):
        ctx = ctx + (exps[s] * inv) * kv[s * TB:(s + 1) * TB, D:]   # (TB, D) f32

    # fc(cat([base, attn_out])) = base@w_fc_base + ctx@(w_o@w_fc_attn) + fused bias
    out = fc_base + jnp.dot(ctx.astype(jnp.bfloat16), wfca_ref[...],
                            preferred_element_type=jnp.float32) + bfc_ref[...]
    out_ref[...] = out.astype(out_ref.dtype)


def prepare_params(params, base_dim):
    """Trace-time weight fusion + bf16 cast for native MXU rate."""
    D = base_dim
    scale = 1.0 / math.sqrt(D)                   # single head -> head_dim = D
    w_fc_base = params["w_fc"][:D]               # (D, F)
    w_fc_attn = params["w_fc"][D:]               # (D, F)

    w_qfc = jnp.concatenate([params["w_q"] * scale, w_fc_base], axis=1)   # (D, D+F)
    b_q = params["b_q"] * scale                                           # (1, D)

    w_sk = params["w_sp"] @ params["w_k"]
    w_sv = params["w_sp"] @ params["w_v"]
    w_skv = jnp.concatenate([w_sk, w_sv], axis=1)                         # (Ds, 2D)
    b_sk = params["b_sp"] @ params["w_k"] + params["b_k"]
    b_sv = params["b_sp"] @ params["w_v"] + params["b_v"]
    b_skv = jnp.concatenate([b_sk, b_sv], axis=1)                         # (1, 2D)

    w_fca = params["w_o"] @ w_fc_attn                                     # (D, F)
    b_fc = params["b_fc"] + params["b_o"] @ w_fc_attn                     # (1, F)

    # Pad the side-dim contraction rows to a multiple of 128 (lane-dense side DMA,
    # full MXU contraction depth); zero rows contribute nothing.
    Ds = w_skv.shape[0]
    Dsp = _round_up(Ds, 128)
    w_skv = jnp.pad(w_skv, ((0, Dsp - Ds), (0, 0)))

    return {
        "w_qfc": w_qfc.astype(jnp.bfloat16),
        "b_q": b_q.astype(jnp.float32),
        "w_skv": w_skv.astype(jnp.bfloat16),
        "b_skv": b_skv.astype(jnp.float32),
        "w_fca": w_fca.astype(jnp.bfloat16),
        "b_fc": b_fc.astype(jnp.float32),
    }


def wine_side_fusion(base, side_seq, fused, *, block_b=512, out_dtype=jnp.float32):
    B, D = base.shape
    _, S, Ds = side_seq.shape
    Dsp = fused["w_skv"].shape[0]
    F = fused["b_fc"].shape[-1]
    assert D % 128 == 0, "base_dim must be a multiple of 128 for aligned in-kernel slices"

    TB = _round_up(min(block_b, B), 8)
    B_pad = _round_up(B, TB)
    grid = (B_pad // TB,)

    # base: pad batch only when needed; bf16 cast happens inside the kernel.
    base_in = base if B_pad == B else jnp.pad(base, ((0, B_pad - B), (0, 0)))

    # side: one fused wrapper pass over the smallest stream:
    # (B, S, Ds) f32 -> (S, B_pad, Dsp) bf16 (s-major so the kernel side tile has
    # lane-dense (TB, 128) last dims and the (S*TB, Dsp) reshape is free).
    side_t = jnp.transpose(side_seq, (1, 0, 2))
    side_in = jnp.pad(side_t, ((0, 0), (0, B_pad - B), (0, Dsp - Ds))).astype(jnp.bfloat16)

    def const(shape):
        n = len(shape)
        return pl.BlockSpec(shape, lambda i: (0,) * n)

    in_specs = [
        pl.BlockSpec((TB, D), lambda i: (i, 0)),             # base tile
        pl.BlockSpec((S, TB, Dsp), lambda i: (0, i, 0)),     # side tile (s-major)
        const(fused["w_qfc"].shape), const(fused["b_q"].shape),
        const(fused["w_skv"].shape), const(fused["b_skv"].shape),
        const(fused["w_fca"].shape), const(fused["b_fc"].shape),
    ]
    out_spec = pl.BlockSpec((TB, F), lambda i: (i, 0))

    flops = 2 * B_pad * (D * (D + F) + S * Dsp * 2 * D + 2 * S * D + D * F)
    weight_bytes = 2 * (D * (D + F) + Dsp * 2 * D + D * F) + 4 * (3 * D + F)
    bytes_accessed = (base.dtype.itemsize * B_pad * D
                      + 2 * B_pad * S * Dsp
                      + jnp.dtype(out_dtype).itemsize * B_pad * F
                      + weight_bytes)

    out = pl.pallas_call(
        wine_side_fusion_kernel,
        out_shape=jax.ShapeDtypeStruct((B_pad, F), out_dtype),
        grid=grid,
        in_specs=in_specs,
        out_specs=out_spec,
        compiler_params=pltpu.CompilerParams(
            dimension_semantics=("parallel",),
            vmem_limit_bytes=48 * 1024 * 1024),
        cost_estimate=pl.CostEstimate(
            flops=int(flops),
            transcendentals=int(B_pad * S),
            bytes_accessed=int(bytes_accessed)),
    )(base_in, side_in,
      fused["w_qfc"], fused["b_q"],
      fused["w_skv"], fused["b_skv"],
      fused["w_fca"], fused["b_fc"])
    return out[:B]


def init_params(key, base_dim, side_dim, fusion_dim):
    ks = jax.random.split(key, 12)

    def lin(kw, kb, din, dout):
        bound = 1.0 / math.sqrt(din)
        w = jax.random.uniform(kw, (din, dout), jnp.float32, -bound, bound)
        b = jax.random.uniform(kb, (1, dout), jnp.float32, -bound, bound)
        return w, b

    w_sp, b_sp = lin(ks[0], ks[1], side_dim, base_dim)          # nn.Linear(side_dim, base_dim)
    w_q, b_q = lin(ks[2], ks[3], base_dim, base_dim)            # MHA in_proj (q)
    w_k, b_k = lin(ks[4], ks[5], base_dim, base_dim)            # MHA in_proj (k)
    w_v, b_v = lin(ks[6], ks[7], base_dim, base_dim)            # MHA in_proj (v)
    w_o, b_o = lin(ks[8], ks[9], base_dim, base_dim)            # MHA out_proj
    w_fc, b_fc = lin(ks[10], ks[11], 2 * base_dim, fusion_dim)  # nn.Linear(2*base_dim, fusion_dim)
    return dict(w_sp=w_sp, b_sp=b_sp, w_q=w_q, b_q=b_q, w_k=w_k, b_k=b_k,
                w_v=w_v, b_v=b_v, w_o=w_o, b_o=b_o, w_fc=w_fc, b_fc=b_fc)


def reference(base, side_seq, params):
    """Pure-JAX f32 reference mirroring the PyTorch forward (unfused weights)."""
    D = base.shape[1]
    sp = jnp.einsum("bsd,de->bse", side_seq, params["w_sp"]) + params["b_sp"]
    q = base @ params["w_q"] + params["b_q"]
    k = jnp.einsum("bse,ef->bsf", sp, params["w_k"]) + params["b_k"]
    v = jnp.einsum("bse,ef->bsf", sp, params["w_v"]) + params["b_v"]
    scores = jnp.einsum("bd,bsd->bs", q, k) / math.sqrt(D)
    p = jax.nn.softmax(scores, axis=-1)
    ctx = jnp.einsum("bs,bsd->bd", p, v)
    attn_out = ctx @ params["w_o"] + params["b_o"]
    fused_in = jnp.concatenate([base, attn_out], axis=-1)
    return fused_in @ params["w_fc"] + params["b_fc"]


if __name__ == "__main__":
    B = 20                # batch (padded in-wrapper to a multiple of the 8-row tile)
    S = 4                 # num_side_tokens
    side_dim = 64
    base_dim = 256
    fusion_dim = 256

    key = jax.random.PRNGKey(0)
    k_base, k_side, k_params = jax.random.split(key, 3)

    base = jax.random.normal(k_base, (B, base_dim), jnp.float32)
    side_seq = jax.random.normal(k_side, (B, S, side_dim), jnp.float32)
    params = init_params(k_params, base_dim, side_dim, fusion_dim)
    fused_params = prepare_params(params, base_dim)

    ref = jax.block_until_ready(reference(base, side_seq, params))

    # Default (large-tile) path: single grid step at this demo size.
    out = jax.block_until_ready(wine_side_fusion(base, side_seq, fused_params))
    # bf16 MXU inputs with f32 accumulation + approx reciprocal in the softmax ->
    # compare against the f32 module reference with a bf16-appropriate tolerance.
    np.testing.assert_allclose(np.asarray(out), np.asarray(ref), rtol=2e-2, atol=2e-2)

    # Small-tile path: exercises the multi-step grid + batch padding (TB=8, 3 steps).
    out_small = jax.block_until_ready(
        wine_side_fusion(base, side_seq, fused_params, block_b=8))
    np.testing.assert_allclose(np.asarray(out_small), np.asarray(ref), rtol=2e-2, atol=2e-2)

    print("KERNEL_OK")
</pallas_src>

<mosaic_0001>
module attributes {stable_mosaic.version = 11 : i64} {
  func.func @wine_side_fusion_kernel(%arg0: i32, %arg1: memref<24x256xf32, #tpu.memory_space<vmem>>, %arg2: memref<4x24x128xbf16, #tpu.memory_space<vmem>>, %arg3: memref<256x512xbf16, #tpu.memory_space<vmem>>, %arg4: memref<1x256xf32, #tpu.memory_space<vmem>>, %arg5: memref<128x512xbf16, #tpu.memory_space<vmem>>, %arg6: memref<1x512xf32, #tpu.memory_space<vmem>>, %arg7: memref<256x256xbf16, #tpu.memory_space<vmem>>, %arg8: memref<1x256xf32, #tpu.memory_space<vmem>>, %arg9: memref<24x256xf32, #tpu.memory_space<vmem>>) attributes {dimension_semantics = [#tpu.dimension_semantics<parallel>], iteration_bounds = array<i64: 1>, scalar_prefetch = 0 : i64, scratch_operands = 0 : i64, tpu.core_type = #tpu.core_type<tc>, window_params = [{transform_indices = @transform_0, window_bounds = array<i64: 24, 256>}, {transform_indices = @transform_1, window_bounds = array<i64: 4, 24, 128>}, {pipeline_mode = #tpu.pipeline_mode<synchronous>, transform_indices = @transform_2, window_bounds = array<i64: 256, 512>}, {pipeline_mode = #tpu.pipeline_mode<synchronous>, transform_indices = @transform_3, window_bounds = array<i64: 1, 256>}, {pipeline_mode = #tpu.pipeline_mode<synchronous>, transform_indices = @transform_4, window_bounds = array<i64: 128, 512>}, {pipeline_mode = #tpu.pipeline_mode<synchronous>, transform_indices = @transform_5, window_bounds = array<i64: 1, 512>}, {pipeline_mode = #tpu.pipeline_mode<synchronous>, transform_indices = @transform_6, window_bounds = array<i64: 256, 256>}, {pipeline_mode = #tpu.pipeline_mode<synchronous>, transform_indices = @transform_7, window_bounds = array<i64: 1, 256>}, {transform_indices = @transform_8, window_bounds = array<i64: 24, 256>}]} {
    %c0 = arith.constant 0 : index
    %c0_0 = arith.constant 0 : index
    %0 = vector.load %arg1[%c0, %c0_0] : memref<24x256xf32, #tpu.memory_space<vmem>>, vector<24x256xf32>
    %1 = arith.truncf %0 : vector<24x256xf32> to vector<24x256xbf16>
    %c0_1 = arith.constant 0 : index
    %c0_2 = arith.constant 0 : index
    %c0_3 = arith.constant 0 : index
    %2 = vector.load %arg2[%c0_1, %c0_2, %c0_3] : memref<4x24x128xbf16, #tpu.memory_space<vmem>>, vector<4x24x128xbf16>
    %3 = vector.shape_cast %2 : vector<4x24x128xbf16> to vector<96x128xbf16>
    %c0_4 = arith.constant 0 : index
    %c0_5 = arith.constant 0 : index
    %4 = vector.load %arg3[%c0_4, %c0_5] : memref<256x512xbf16, #tpu.memory_space<vmem>>, vector<256x512xbf16>
    %cst = arith.constant dense<0.000000e+00> : vector<24x512xf32>
    %5 = tpu.matmul %1, %4, %cst {dimension_numbers = #tpu.dot_dimension_numbers<[1], [0], [0], [1], [0, 0, 1, 1], [], []>} : vector<24x256xbf16>, vector<256x512xbf16>, vector<24x512xf32> -> vector<24x512xf32>
    %6 = vector.extract_strided_slice %5 {offsets = [0, 0], sizes = [24, 256], strides = [1, 1]} : vector<24x512xf32> to vector<24x256xf32>
    %c0_6 = arith.constant 0 : index
    %c0_7 = arith.constant 0 : index
    %7 = vector.load %arg4[%c0_6, %c0_7] : memref<1x256xf32, #tpu.memory_space<vmem>>, vector<1x256xf32>
    %8 = vector.broadcast %7 : vector<1x256xf32> to vector<24x256xf32>
    %9 = arith.addf %6, %8 : vector<24x256xf32>
    %10 = vector.extract_strided_slice %5 {offsets = [0, 256], sizes = [24, 256], strides = [1, 1]} : vector<24x512xf32> to vector<24x256xf32>
    %c0_8 = arith.constant 0 : index
    %c0_9 = arith.constant 0 : index
    %11 = vector.load %arg5[%c0_8, %c0_9] : memref<128x512xbf16, #tpu.memory_space<vmem>>, vector<128x512xbf16>
    %cst_10 = arith.constant dense<0.000000e+00> : vector<96x512xf32>
    %12 = tpu.matmul %3, %11, %cst_10 {dimension_numbers = #tpu.dot_dimension_numbers<[1], [0], [0], [1], [0, 0, 1, 1], [], []>} : vector<96x128xbf16>, vector<128x512xbf16>, vector<96x512xf32> -> vector<96x512xf32>
    %c0_11 = arith.constant 0 : index
    %c0_12 = arith.constant 0 : index
    %13 = vector.load %arg6[%c0_11, %c0_12] : memref<1x512xf32, #tpu.memory_space<vmem>>, vector<1x512xf32>
    %14 = vector.broadcast %13 : vector<1x512xf32> to vector<96x512xf32>
    %15 = arith.addf %12, %14 : vector<96x512xf32>
    %16 = vector.extract_strided_slice %15 {offsets = [0, 0], sizes = [24, 256], strides = [1, 1]} : vector<96x512xf32> to vector<24x256xf32>
    %17 = arith.mulf %9, %16 : vector<24x256xf32>
    %cst_13 = arith.constant dense<0.000000e+00> : vector<24xf32>
    %18 = vector.multi_reduction <add>, %17, %cst_13 [1] : vector<24x256xf32> to vector<24xf32>
    %19 = vector.shape_cast %18 : vector<24xf32> to vector<24x1xf32>
    %20 = vector.extract_strided_slice %15 {offsets = [24, 0], sizes = [24, 256], strides = [1, 1]} : vector<96x512xf32> to vector<24x256xf32>
    %21 = arith.mulf %9, %20 : vector<24x256xf32>
    %cst_14 = arith.constant dense<0.000000e+00> : vector<24xf32>
    %22 = vector.multi_reduction <add>, %21, %cst_14 [1] : vector<24x256xf32> to vector<24xf32>
    %23 = vector.shape_cast %22 : vector<24xf32> to vector<24x1xf32>
    %24 = vector.extract_strided_slice %15 {offsets = [48, 0], sizes = [24, 256], strides = [1, 1]} : vector<96x512xf32> to vector<24x256xf32>
    %25 = arith.mulf %9, %24 : vector<24x256xf32>
    %cst_15 = arith.constant dense<0.000000e+00> : vector<24xf32>
    %26 = vector.multi_reduction <add>, %25, %cst_15 [1] : vector<24x256xf32> to vector<24xf32>
    %27 = vector.shape_cast %26 : vector<24xf32> to vector<24x1xf32>
    %28 = vector.extract_strided_slice %15 {offsets = [72, 0], sizes = [24, 256], strides = [1, 1]} : vector<96x512xf32> to vector<24x256xf32>
    %29 = arith.mulf %9, %28 : vector<24x256xf32>
    %cst_16 = arith.constant dense<0.000000e+00> : vector<24xf32>
    %30 = vector.multi_reduction <add>, %29, %cst_16 [1] : vector<24x256xf32> to vector<24xf32>
    %31 = vector.shape_cast %30 : vector<24xf32> to vector<24x1xf32>
    %32 = arith.maximumf %19, %23 : vector<24x1xf32>
    %33 = arith.maximumf %32, %27 : vector<24x1xf32>
    %34 = arith.maximumf %33, %31 : vector<24x1xf32>
    %35 = arith.subf %19, %34 : vector<24x1xf32>
    %36 = math.exp %35 : vector<24x1xf32>
    %37 = arith.subf %23, %34 : vector<24x1xf32>
    %38 = math.exp %37 : vector<24x1xf32>
    %39 = arith.subf %27, %34 : vector<24x1xf32>
    %40 = math.exp %39 : vector<24x1xf32>
    %41 = arith.subf %31, %34 : vector<24x1xf32>
    %42 = math.exp %41 : vector<24x1xf32>
    %43 = arith.addf %36, %38 : vector<24x1xf32>
    %44 = arith.addf %43, %40 : vector<24x1xf32>
    %45 = arith.addf %44, %42 : vector<24x1xf32>
    %46 = tpu.reciprocal %45 {approx = true} : vector<24x1xf32> -> vector<24x1xf32>
    %47 = arith.mulf %36, %46 : vector<24x1xf32>
    %48 = vector.extract_strided_slice %15 {offsets = [0, 256], sizes = [24, 256], strides = [1, 1]} : vector<96x512xf32> to vector<24x256xf32>
    %49 = vector.broadcast %47 : vector<24x1xf32> to vector<24x256xf32>
    %50 = arith.mulf %49, %48 : vector<24x256xf32>
    %51 = arith.mulf %38, %46 : vector<24x1xf32>
    %52 = vector.extract_strided_slice %15 {offsets = [24, 256], sizes = [24, 256], strides = [1, 1]} : vector<96x512xf32> to vector<24x256xf32>
    %53 = vector.broadcast %51 : vector<24x1xf32> to vector<24x256xf32>
    %54 = arith.mulf %53, %52 : vector<24x256xf32>
    %55 = arith.addf %50, %54 : vector<24x256xf32>
    %56 = arith.mulf %40, %46 : vector<24x1xf32>
    %57 = vector.extract_strided_slice %15 {offsets = [48, 256], sizes = [24, 256], strides = [1, 1]} : vector<96x512xf32> to vector<24x256xf32>
    %58 = vector.broadcast %56 : vector<24x1xf32> to vector<24x256xf32>
    %59 = arith.mulf %58, %57 : vector<24x256xf32>
    %60 = arith.addf %55, %59 : vector<24x256xf32>
    %61 = arith.mulf %42, %46 : vector<24x1xf32>
    %62 = vector.extract_strided_slice %15 {offsets = [72, 256], sizes = [24, 256], strides = [1, 1]} : vector<96x512xf32> to vector<24x256xf32>
    %63 = vector.broadcast %61 : vector<24x1xf32> to vector<24x256xf32>
    %64 = arith.mulf %63, %62 : vector<24x256xf32>
    %65 = arith.addf %60, %64 : vector<24x256xf32>
    %66 = arith.truncf %65 : vector<24x256xf32> to vector<24x256xbf16>
    %c0_17 = arith.constant 0 : index
    %c0_18 = arith.constant 0 : index
    %67 = vector.load %arg7[%c0_17, %c0_18] : memref<256x256xbf16, #tpu.memory_space<vmem>>, vector<256x256xbf16>
    %cst_19 = arith.constant dense<0.000000e+00> : vector<24x256xf32>
    %68 = tpu.matmul %66, %67, %cst_19 {dimension_numbers = #tpu.dot_dimension_numbers<[1], [0], [0], [1], [0, 0, 1, 1], [], []>} : vector<24x256xbf16>, vector<256x256xbf16>, vector<24x256xf32> -> vector<24x256xf32>
    %69 = arith.addf %10, %68 : vector<24x256xf32>
    %c0_20 = arith.constant 0 : index
    %c0_21 = arith.constant 0 : index
    %70 = vector.load %arg8[%c0_20, %c0_21] : memref<1x256xf32, #tpu.memory_space<vmem>>, vector<1x256xf32>
    %71 = vector.broadcast %70 : vector<1x256xf32> to vector<24x256xf32>
    %72 = arith.addf %69, %71 : vector<24x256xf32>
    %c0_22 = arith.constant 0 : index
    %c0_23 = arith.constant 0 : index
    %73 = vector.load %arg9[%c0_22, %c0_23] : memref<24x256xf32, #tpu.memory_space<vmem>>, vector<24x256xf32>
    tpu.vector_store %arg9[%c0_22, %c0_23], %72 {strides = array<i32>} : memref<24x256xf32, #tpu.memory_space<vmem>>, vector<24x256xf32>,
    return
  }
  func.func @transform_0(%arg0: i32) -> (i32, i32) {
    %c0_i32 = arith.constant 0 : i32
    %c0_i32_0 = arith.constant 0 : i32
    return %arg0, %c0_i32 : i32, i32
  }
  func.func @transform_1(%arg0: i32) -> (i32, i32, i32) {
    %c0_i32 = arith.constant 0 : i32
    %c0_i32_0 = arith.constant 0 : i32
    %c0_i32_1 = arith.constant 0 : i32
    return %c0_i32, %arg0, %c0_i32_0 : i32, i32, i32
  }
  func.func @transform_2(%arg0: i32) -> (i32, i32) {
    %c0_i32 = arith.constant 0 : i32
    %c0_i32_0 = arith.constant 0 : i32
    %c0_i32_1 = arith.constant 0 : i32
    return %c0_i32, %c0_i32_0 : i32, i32
  }
  func.func @transform_3(%arg0: i32) -> (i32, i32) {
    %c0_i32 = arith.constant 0 : i32
    %c0_i32_0 = arith.constant 0 : i32
    %c0_i32_1 = arith.constant 0 : i32
    return %c0_i32, %c0_i32_0 : i32, i32
  }
  func.func @transform_4(%arg0: i32) -> (i32, i32) {
    %c0_i32 = arith.constant 0 : i32
    %c0_i32_0 = arith.constant 0 : i32
    %c0_i32_1 = arith.constant 0 : i32
    return %c0_i32, %c0_i32_0 : i32, i32
  }
  func.func @transform_5(%arg0: i32) -> (i32, i32) {
    %c0_i32 = arith.constant 0 : i32
    %c0_i32_0 = arith.constant 0 : i32
    %c0_i32_1 = arith.constant 0 : i32
    return %c0_i32, %c0_i32_0 : i32, i32
  }
  func.func @transform_6(%arg0: i32) -> (i32, i32) {
    %c0_i32 = arith.constant 0 : i32
    %c0_i32_0 = arith.constant 0 : i32
    %c0_i32_1 = arith.constant 0 : i32
    return %c0_i32, %c0_i32_0 : i32, i32
  }
  func.func @transform_7(%arg0: i32) -> (i32, i32) {
    %c0_i32 = arith.constant 0 : i32
    %c0_i32_0 = arith.constant 0 : i32
    %c0_i32_1 = arith.constant 0 : i32
    return %c0_i32, %c0_i32_0 : i32, i32
  }
  func.func @transform_8(%arg0: i32) -> (i32, i32) {
    %c0_i32 = arith.constant 0 : i32
    %c0_i32_0 = arith.constant 0 : i32
    return %arg0, %c0_i32 : i32, i32
  }
}

</mosaic_0001>

<bundles_post_ra>
// kernel: tpu_custom_call.1
= control target key start
LH: loop header
LB: loop body
LE: loop exit
PB: predicated region body
PF: predicated region fallthrough
CT: control target
= control target key end

     0   :  { %13 = vsyncpa [#allocation3], 0  ;;  %s2356_s0 = inlined_call_operand.hbm [shape: f32[24,256], index: 0, kind: input, shape index: {}]   ;;  %s2357_s1 = inlined_call_operand.hbm [shape: bf16[4,24,128], index: 1, kind: input, shape index: {}]   ;;  %s2358_s2 = inlined_call_operand.hbm [shape: bf16[256,512], index: 2, kind: input, shape index: {}]   ;;  %s2359_s3 = inlined_call_operand.vmem [shape: f32[1,256], index: 3, kind: input, shape index: {}]   ;;  %s2360_s4 = inlined_call_operand.hbm [shape: bf16[128,512], index: 4, kind: input, shape index: {}]   ;;  %s2361_s5 = inlined_call_operand.vmem [shape: f32[1,512], index: 5, kind: input, shape index: {}]   ;;  %s2362_s6 = inlined_call_operand.hbm [shape: bf16[256,256], index: 6, kind: input, shape index: {}]   ;;  %s2363_s7 = inlined_call_operand.vmem [shape: f32[1,256], index: 7, kind: input, shape index: {}]   ;;  %s2364_s8 = inlined_call_operand.hbm [shape: f32[24,256], index: 8, kind: output, shape index: {}]  }
   0x1   :  { %14 = vsyncpa [#allocation6], 0 }
   0x2   :  { %15 = vsyncpa [#allocation9], 0 }
   0x3   :  { %16 = vsyncpa [#allocation4], 0  ;;  %s2063_s27 = smov [#allocation5]  }
   0x4   :  { %s34_s28 = sshll.u32 %s2063_s27, 4  ;;  %s35_s28 = int_to_ptr.vmem [resolvable:$true] %s34_s28 }
   0x5   :  { %s1943_s29 = scalar_lea.vmem %s35_s28, 768  ;;  %p1948_p1 = scmp.lt.s32.totalorder %s35_s28, %s35_s28 }
   0x6   :  { %p1944_p0 = scmp.ne.s32.totalorder %s35_s28, %s1943_s29  ;;  %p1949_p2 = scmp.lt.s32.totalorder %s1943_s29, %s1943_s29 }
   0x8   :  { %p1950_p3 = por %p1949_p2, %p1948_p1 }
   0xa   :  { %p1951_p4 = pnand %p1950_p3, %p1944_p0 }
   0xc   :  { %1954 = shalt.err (!%p1951_p4)
}
   0xd   :  { %s2064_s30 = smov 64   ;;  %s2065_s9 = smov 4  }
   0xe   :  { %40 = dma.hbm_to_vmem [thread:$0]  %s2357_s1, 768, %s35_s28, [#allocation6], %s2064_s30, %s2064_s30, %s2065_s9  }
   0xf   :  { %s2066_s12 = smov [#allocation8]   ;;  %s2067_s14 = smov [#allocation2]  }
  0x10   :  { %s60_s13 = sshll.u32 %s2066_s12, 4  ;;  %s22_s15 = sshll.u32 %s2067_s14, 4  ;;  %s61_s13 = int_to_ptr.vmem [resolvable:$true] %s60_s13  ;;  %s23_s15 = int_to_ptr.vmem [resolvable:$true] %s22_s15 }
  0x11   :  { %s1963_s16 = scalar_lea.vmem %s61_s13, 4096  ;;  %p1968_p6 = scmp.lt.s32.totalorder %s61_s13, %s61_s13 }
  0x12   :  { %p1964_p5 = scmp.ne.s32.totalorder %s61_s13, %s1963_s16  ;;  %p1969_p7 = scmp.lt.s32.totalorder %s1963_s16, %s1963_s16 }
  0x14   :  { %p1970_p8 = por %p1969_p7, %p1968_p6 }
  0x16   :  { %p1971_p9 = pnand %p1970_p8, %p1964_p5 }
  0x18   :  { %1974 = shalt.err (!%p1971_p9)
}
  0x19   :  { %s2068_s17 = smov 256   ;;  %s2069_s18 = smov 16  }
  0x1a   :  { %66 = dma.hbm_to_vmem [thread:$0]  %s2360_s4, 4096, %s61_s13, [#allocation9], %s2068_s17, %s2068_s17, %s2069_s18  }
  0x1b   :  { %s1983_s1 = scalar_lea.vmem %s23_s15, 768  ;;  %p1988_p11 = scmp.lt.s32.totalorder %s23_s15, %s23_s15 }
  0x1c   :  { %p1984_p10 = scmp.ne.s32.totalorder %s23_s15, %s1983_s1  ;;  %p1989_p12 = scmp.lt.s32.totalorder %s1983_s1, %s1983_s1 }
  0x1e   :  { %p1990_p13 = por %p1989_p12, %p1988_p11 }
  0x20   :  { %p1991_p0 = pnand %p1990_p13, %p1984_p10 }
  0x22   :  { %1994 = shalt.err (!%p1991_p0)
}
  0x23   :  { %28 = dma.hbm_to_vmem [thread:$0]  %s2356_s0, 768, %s23_s15, [#allocation3], %s2068_s17, %s2068_s17, %s2069_s18  }
  0x24   :  { %s2070_s23 = smov [#allocation7]   ;;  %s2071_s25 = smov [#allocation10]  }
  0x25   :  { %s46_s24 = sshll.u32 %s2070_s23, 4  ;;  %s74_s4 = sshll.u32 %s2071_s25, 4  ;;  %s47_s24 = int_to_ptr.vmem [resolvable:$true] %s46_s24  ;;  %s75_s4 = int_to_ptr.vmem [resolvable:$true] %s74_s4 }
  0x26   :  { %s2003_s26 = scalar_lea.vmem %s47_s24, 8192  ;;  %p2008_p2 = scmp.lt.s32.totalorder %s47_s24, %s47_s24 }
  0x27   :  { %p2004_p1 = scmp.ne.s32.totalorder %s47_s24, %s2003_s26  ;;  %p2009_p3 = scmp.lt.s32.totalorder %s2003_s26, %s2003_s26 }
  0x29   :  { %p2010_p4 = por %p2009_p3, %p2008_p2 }
  0x2b   :  { %p2011_p5 = pnand %p2010_p4, %p2004_p1 }
  0x2d   :  { %2014 = shalt.err (!%p2011_p5)
}
  0x2e   :  { %52 = dma.hbm_to_vmem [thread:$0]  %s2358_s2, 8192, %s47_s24, [#allocation6], %s2068_s17, %s2068_s17, %s2069_s18  }
  0x2f   :  { %s2023_s0 = scalar_lea.vmem %s75_s4, 4096  ;;  %p2028_p7 = scmp.lt.s32.totalorder %s75_s4, %s75_s4 }
  0x30   :  { %p2024_p6 = scmp.ne.s32.totalorder %s75_s4, %s2023_s0  ;;  %p2029_p8 = scmp.lt.s32.totalorder %s2023_s0, %s2023_s0 }
  0x32   :  { %p2030_p9 = por %p2029_p8, %p2028_p7 }
  0x34   :  { %p2031_p10 = pnand %p2030_p9, %p2024_p6 }
  0x36   :  { %2034 = shalt.err (!%p2031_p10)
}
  0x37   :  { %s2072_s29 = smov 128   ;;  %s2073_s30 = smov 8  }
  0x38   :  { %80 = dma.hbm_to_vmem [thread:$0]  %s2362_s6, 4096, %s75_s4, [#allocation9], %s2072_s29, %s2072_s29, %s2073_s30  }
  0x39   :  { %2055 = dma.done.wait [#allocation3], 768  }
  0x3a   :  { %2056 = vsyncadd [#allocation3], 4294966528 }
  0x3b   :  { %2057 = dma.done.wait [#allocation6], 8960  }
  0x3c   :  { %2058 = vsyncadd [#allocation6], 4294958336 }
  0x3d   :  { %2059 = dma.done.wait [#allocation9], 8192  }
  0x3e   :  { %2060 = vsyncadd [#allocation9], 4294959104  ;;  %v1707_v0 = vld [vmem:[#allocation7 + $0xe4] ss:$16 sps:$4 sm:$0xff]   ;;  %v1709_v1 = vld [vmem:[#allocation7 + $0xe0] ss:$16 sps:$4 sm:$0xff]  }
  0x3f   :  { %505 = vmatprep.subr.bf16.mxu0 %v1707_v0  ;;  %v1710_v2 = vld [vmem:[#allocation7 + $0xc4] ss:$16 sps:$4 sm:$0xff]   ;;  %v1712_v3 = vld [vmem:[#allocation7 + $0xc0] ss:$16 sps:$4 sm:$0xff]   ;;  %v100_v13 = vld [vmem:[#allocation2 + $0x8] sm:$0xff] }
  0x40   :  { %506 = vmatpush1.bf16.msra.mxu0 %v1709_v1  ;;  %v1713_v4 = vld [vmem:[#allocation7 + $0xa4] ss:$16 sps:$4 sm:$0xff]   ;;  %v1715_v5 = vld [vmem:[#allocation7 + $0xa0] ss:$16 sps:$4 sm:$0xff]   ;;  %v102_v14 = vld [vmem:[#allocation2 + $0x18] sm:$0xff] }
  0x41   :  { %507 = vmatprep.subr.bf16.mxu0 %v1710_v2  ;;  %v1716_v6 = vld [vmem:[#allocation7 + $0x84] ss:$16 sps:$4 sm:$0xff]   ;;  %v1718_v7 = vld [vmem:[#allocation7 + $0x80] ss:$16 sps:$4 sm:$0xff]   ;;  %v106_v15 = vpack.c.bf16 %v102_v14, %v100_v13  ;;  %v1785_v26 = vld [vmem:[#allocation7 + $0xec] ss:$16 sps:$4 sm:$0xff]  }
  0x42   :  { %v1719_v8 = vld [vmem:[#allocation7 + $0x64] ss:$16 sps:$4 sm:$0xff]   ;;  %v1721_v9 = vld [vmem:[#allocation7 + $0x60] ss:$16 sps:$4 sm:$0xff]   ;;  %v1787_v27 = vld [vmem:[#allocation7 + $0xe8] ss:$16 sps:$4 sm:$0xff]   ;;  %556 = vmatprep.subr.bf16.mxu1 %v1785_v26 }
  0x43   :  { %v1722_v10 = vld [vmem:[#allocation7 + $0x44] ss:$16 sps:$4 sm:$0xff]   ;;  %v1724_v11 = vld [vmem:[#allocation7 + $0x40] ss:$16 sps:$4 sm:$0xff]   ;;  %537 = vmatprep.mubr.bf16.mxu0 %v106_v15  ;;  %588 = vmatprep.mubr.bf16.mxu1 %v106_v15  ;;  %v1788_v29 = vld [vmem:[#allocation7 + $0xcc] ss:$16 sps:$4 sm:$0xff]  }
  0x44   :  { %508 = vmatpush1.bf16.msra.mxu0 %v1712_v3  ;;  %v1725_v12 = vld [vmem:[#allocation7 + $0x24] ss:$16 sps:$4 sm:$0xff]   ;;  %v1727_v16 = vld [vmem:[#allocation7 + $0x20] ss:$16 sps:$4 sm:$0xff]   ;;  %557 = vmatpush1.bf16.msra.mxu1 %v1787_v27  ;;  %v1790_v31 = vld [vmem:[#allocation7 + $0xc8] ss:$16 sps:$4 sm:$0xff]  }
  0x45   :  { %509 = vmatprep.subr.bf16.mxu0 %v1713_v4  ;;  %v1728_v17 = vld [vmem:[#allocation7 + $0x4] ss:$16 sps:$4 sm:$0xff]   ;;  %v1730_v18 = vld [vmem:[#allocation7] ss:$16 sps:$4 sm:$0xff]   ;;  %558 = vmatprep.subr.bf16.mxu1 %v1788_v29  ;;  %v1791_v32 = vld [vmem:[#allocation7 + $0xac] ss:$16 sps:$4 sm:$0xff]  }
  0x46   :  { %v1731_v19 = vld [vmem:[#allocation7 + $0x1e4] ss:$16 sps:$4 sm:$0xff]   ;;  %v1733_v20 = vld [vmem:[#allocation7 + $0x1e0] ss:$16 sps:$4 sm:$0xff]   ;;  %v1793_v35 = vld [vmem:[#allocation7 + $0xa8] ss:$16 sps:$4 sm:$0xff]  }
  0x47   :  { %v1734_v21 = vld [vmem:[#allocation7 + $0x1c4] ss:$16 sps:$4 sm:$0xff]   ;;  %v1736_v22 = vld [vmem:[#allocation7 + $0x1c0] ss:$16 sps:$4 sm:$0xff]   ;;  %v1794_v36 = vld [vmem:[#allocation7 + $0x8c] ss:$16 sps:$4 sm:$0xff]  }
  0x48   :  { %510 = vmatpush1.bf16.msra.mxu0 %v1715_v5  ;;  %v1737_v23 = vld [vmem:[#allocation7 + $0x1a4] ss:$16 sps:$4 sm:$0xff]   ;;  %v1739_v24 = vld [vmem:[#allocation7 + $0x1a0] ss:$16 sps:$4 sm:$0xff]   ;;  %559 = vmatpush1.bf16.msra.mxu1 %v1790_v31  ;;  %v1796_v39 = vld [vmem:[#allocation7 + $0x88] ss:$16 sps:$4 sm:$0xff]  }
  0x49   :  { %511 = vmatprep.subr.bf16.mxu0 %v1716_v6  ;;  %v1740_v25 = vld [vmem:[#allocation7 + $0x184] ss:$16 sps:$4 sm:$0xff]   ;;  %v1742_v28 = vld [vmem:[#allocation7 + $0x180] ss:$16 sps:$4 sm:$0xff]   ;;  %560 = vmatprep.subr.bf16.mxu1 %v1791_v32  ;;  %v1797_v40 = vld [vmem:[#allocation7 + $0x6c] ss:$16 sps:$4 sm:$0xff]  }
  0x4a   :  { %v1743_v30 = vld [vmem:[#allocation7 + $0x164] ss:$16 sps:$4 sm:$0xff]   ;;  %v1745_v33 = vld [vmem:[#allocation7 + $0x160] ss:$16 sps:$4 sm:$0xff]   ;;  %v1799_v43 = vld [vmem:[#allocation7 + $0x68] ss:$16 sps:$4 sm:$0xff]  }
  0x4b   :  { %v1746_v34 = vld [vmem:[#allocation7 + $0x144] ss:$16 sps:$4 sm:$0xff]   ;;  %v1748_v37 = vld [vmem:[#allocation7 + $0x140] ss:$16 sps:$4 sm:$0xff]   ;;  %v1800_v44 = vld [vmem:[#allocation7 + $0x4c] ss:$16 sps:$4 sm:$0xff]  }
  0x4c   :  { %512 = vmatpush1.bf16.msra.mxu0 %v1718_v7  ;;  %v1749_v38 = vld [vmem:[#allocation7 + $0x124] ss:$16 sps:$4 sm:$0xff]   ;;  %561 = vmatpush1.bf16.msra.mxu1 %v1793_v35  ;;  %v1751_v41 = vld [vmem:[#allocation7 + $0x120] ss:$16 sps:$4 sm:$0xff]   ;;  %v104_v49 = vld [vmem:[#allocation2 + $0x28] sm:$0xff]  ;;  %v2074_v7 = vmov 0  }
  0x4d   :  { %513 = vmatprep.subr.bf16.mxu0 %v1719_v8  ;;  %562 = vmatprep.subr.bf16.mxu1 %v1794_v36  ;;  %v1752_v42 = vld [vmem:[#allocation7 + $0x104] ss:$16 sps:$4 sm:$0xff]   ;;  %v1754_v45 = vld [vmem:[#allocation7 + $0x100] ss:$16 sps:$4 sm:$0xff]   ;;  %v1802_v50 = vld [vmem:[#allocation7 + $0x48] ss:$16 sps:$4 sm:$0xff]   ;;  %v2147_v55 = vpack.c.bf16 %v104_v49, %v104_v49 }
  0x4e   :  { %v99_v46 = vld [vmem:[#allocation2] sm:$0xff]  ;;  %v101_v47 = vld [vmem:[#allocation2 + $0x10] sm:$0xff]  ;;  %v1803_v51 = vld [vmem:[#allocation7 + $0x2c] ss:$16 sps:$4 sm:$0xff]  }
  0x4f   :  { %v1757_v48 = vld [vmem:[#allocation8 + $0xe4] ss:$16 sps:$4 sm:$0xff]   ;;  %v2145_v52 = vpack.c.bf16 %v101_v47, %v99_v46  ;;  %v1755_v53 = vld [vmem:[#allocation8 + $0xe0] ss:$16 sps:$4 sm:$0xff]   ;;  %v1805_v56 = vld [vmem:[#allocation7 + $0x28] ss:$16 sps:$4 sm:$0xff]  }
  0x50   :  { %514 = vmatpush1.bf16.msra.mxu0 %v1721_v9  ;;  %563 = vmatpush1.bf16.msra.mxu1 %v1796_v39  ;;  %v1760_v54 = vld [vmem:[#allocation8 + $0xc4] ss:$16 sps:$4 sm:$0xff]   ;;  %v1758_v57 = vld [vmem:[#allocation8 + $0xc0] ss:$16 sps:$4 sm:$0xff]   ;;  %v1806_v59 = vld [vmem:[#allocation7 + $0xc] ss:$16 sps:$4 sm:$0xff]  }
  0x51   :  { %515 = vmatprep.subr.bf16.mxu0 %v1722_v10  ;;  %564 = vmatprep.subr.bf16.mxu1 %v1797_v40  ;;  %v103_v58 = vld [vmem:[#allocation2 + $0x20] sm:$0xff]  ;;  %v1808_v61 = vld [vmem:[#allocation7 + $0x8] ss:$16 sps:$4 sm:$0xff]   ;;  %v1809_v62 = vld [vmem:[#allocation7 + $0x1ec] ss:$16 sps:$4 sm:$0xff]  }
  0x52   :  { %v1763_v60 = vld [vmem:[#allocation8 + $0xa4] ss:$16 sps:$4 sm:$0xff]   ;;  %v1761_v63 = vld [vmem:[#allocation8 + $0xa0] ss:$16 sps:$4 sm:$0xff]   ;;  %v2151_v1 = vpack.c.bf16 %v103_v58, %v103_v58  ;;  %v1811_v2 = vld [vmem:[#allocation7 + $0x1e8] ss:$16 sps:$4 sm:$0xff]  }
  0x53   :  { %v1766_v0 = vld [vmem:[#allocation8 + $0x84] ss:$16 sps:$4 sm:$0xff]   ;;  %v1812_v3 = vld [vmem:[#allocation7 + $0x1cc] ss:$16 sps:$4 sm:$0xff]   ;;  %v1764_v4 = vld [vmem:[#allocation8 + $0x80] ss:$16 sps:$4 sm:$0xff]  }
  0x54   :  { %516 = vmatpush1.bf16.msra.mxu0 %v1724_v11  ;;  %565 = vmatpush1.bf16.msra.mxu1 %v1799_v43  ;;  %v1769_v5 = vld [vmem:[#allocation8 + $0x64] ss:$16 sps:$4 sm:$0xff]   ;;  %v1814_v6 = vld [vmem:[#allocation7 + $0x1c8] ss:$16 sps:$4 sm:$0xff]   ;;  %v1815_v8 = vld [vmem:[#allocation7 + $0x1ac] ss:$16 sps:$4 sm:$0xff]  }
  0x55   :  { %517 = vmatprep.subr.bf16.mxu0 %v1725_v12  ;;  %566 = vmatprep.subr.bf16.mxu1 %v1800_v44  ;;  %v1767_v9 = vld [vmem:[#allocation8 + $0x60] ss:$16 sps:$4 sm:$0xff]   ;;  %v1772_v10 = vld [vmem:[#allocation8 + $0x44] ss:$16 sps:$4 sm:$0xff]   ;;  %v1817_v11 = vld [vmem:[#allocation7 + $0x1a8] ss:$16 sps:$4 sm:$0xff]  }
  0x56   :  { %v1818_v12 = vld [vmem:[#allocation7 + $0x18c] ss:$16 sps:$4 sm:$0xff]   ;;  %v1770_v13 = vld [vmem:[#allocation8 + $0x40] ss:$16 sps:$4 sm:$0xff]   ;;  %v1775_v14 = vld [vmem:[#allocation8 + $0x24] ss:$16 sps:$4 sm:$0xff]  }
  0x57   :  { %v1820_v15 = vld [vmem:[#allocation7 + $0x188] ss:$16 sps:$4 sm:$0xff]   ;;  %v1830_v26 = vld [vmem:[#allocation7 + $0x10c] ss:$16 sps:$4 sm:$0xff]  }
  0x58   :  { %518 = vmatpush1.bf16.msra.mxu0 %v1727_v16  ;;  %567 = vmatpush1.bf16.msra.mxu1 %v1802_v50  ;;  %v1821_v16 = vld [vmem:[#allocation7 + $0x16c] ss:$16 sps:$4 sm:$0xff]   ;;  %v1832_v27 = vld [vmem:[#allocation7 + $0x108] ss:$16 sps:$4 sm:$0xff]  }
  0x59   :  { %519 = vmatprep.subr.bf16.mxu0 %v1728_v17  ;;  %568 = vmatprep.subr.bf16.mxu1 %v1803_v51  ;;  %v1773_v17 = vld [vmem:[#allocation8 + $0x20] ss:$16 sps:$4 sm:$0xff]   ;;  %v1780_v29 = vld [vmem:[#allocation5 + $0x8] sm:$0xff]   ;;  %v1782_v36 = vld [vmem:[#allocation5 + $0x18] sm:$0xff]  }
  0x5a   :  { %v1838_v31 = vld [vmem:[#allocation8 + $0xcc] ss:$16 sps:$4 sm:$0xff]   ;;  %v1836_v32 = vld [vmem:[#allocation8 + $0xc8] ss:$16 sps:$4 sm:$0xff]  }
  0x5b   :  { %v1839_v35 = vld [vmem:[#allocation8 + $0xa8] ss:$16 sps:$4 sm:$0xff]   ;;  %v1850_v44 = vld [vmem:[#allocation8 + $0x4c] ss:$16 sps:$4 sm:$0xff]  }
  0x5c   :  { %520 = vmatpush1.bf16.msra.mxu0 %v1730_v18  ;;  %569 = vmatpush1.bf16.msra.mxu1 %v1805_v56  ;;  %v1778_v18 = vld [vmem:[#allocation8 + $0x4] ss:$16 sps:$4 sm:$0xff]   ;;  %v1842_v39 = vld [vmem:[#allocation8 + $0x88] ss:$16 sps:$4 sm:$0xff]   ;;  %v1856_v47 = vld [vmem:[#allocation8 + $0xc] ss:$16 sps:$4 sm:$0xff]  }
  0x5d   :  { %521 = vmatprep.subr.bf16.mxu0 %v1731_v19  ;;  %570 = vmatprep.subr.bf16.mxu1 %v1806_v59  ;;  %v1823_v19 = vld [vmem:[#allocation7 + $0x168] ss:$16 sps:$4 sm:$0xff]   ;;  %v2174_v59 = vld [vmem:[%s2361_s5] sm:$0xf] }
  0x5e   :  { %v1784_v40 = vld [vmem:[#allocation5 + $0x28] sm:$0xff]  }
  0x5f   :  { %v1848_v43 = vld [vmem:[#allocation8 + $0x48] ss:$16 sps:$4 sm:$0xff]  }
  0x60   :  { %522 = vmatpush2.bf16.msra.mxu0 %v1733_v20  ;;  %571 = vmatpush1.bf16.msra.mxu1 %v1808_v61  ;;  %v1824_v20 = vld [vmem:[#allocation7 + $0x14c] ss:$16 sps:$4 sm:$0xff]   ;;  %v1851_v46 = vld [vmem:[#allocation8 + $0x28] ss:$16 sps:$4 sm:$0xff]  }
  0x61   :  { %523 = vmatprep.subr.bf16.mxu0 %v1734_v21  ;;  %572 = vmatprep.subr.bf16.mxu1 %v1809_v62  ;;  %v1776_v21 = vld [vmem:[#allocation8] ss:$16 sps:$4 sm:$0xff]  }
  0x62   :  { %v607_v62 = vld [vmem:[%s2359_s3] sm:$0x3] }
  0x64   :  { %524 = vmatpush2.bf16.msra.mxu0 %v1736_v22  ;;  %573 = vmatpush2.bf16.msra.mxu1 %v1811_v2  ;;  %v1826_v22 = vld [vmem:[#allocation7 + $0x148] ss:$16 sps:$4 sm:$0xff]  }
  0x65   :  { %525 = vmatprep.subr.bf16.mxu0 %v1737_v23  ;;  %574 = vmatprep.subr.bf16.mxu1 %v1812_v3  ;;  %v1827_v23 = vld [vmem:[#allocation7 + $0x12c] ss:$16 sps:$4 sm:$0xff]  }
  0x68   :  { %526 = vmatpush2.bf16.msra.mxu0 %v1739_v24  ;;  %575 = vmatpush2.bf16.msra.mxu1 %v1814_v6  ;;  %v1779_v24 = vld [vmem:[#allocation5] sm:$0xff]  }
  0x69   :  { %527 = vmatprep.subr.bf16.mxu0 %v1740_v25  ;;  %576 = vmatprep.subr.bf16.mxu1 %v1815_v8  ;;  %v1829_v25 = vld [vmem:[#allocation7 + $0x128] ss:$16 sps:$4 sm:$0xff]  }
  0x6c   :  { %528 = vmatpush2.bf16.msra.mxu0 %v1742_v28  ;;  %577 = vmatpush2.bf16.msra.mxu1 %v1817_v11  ;;  %v1835_v28 = vld [vmem:[#allocation8 + $0xec] ss:$16 sps:$4 sm:$0xff]  }
  0x6d   :  { %529 = vmatprep.subr.bf16.mxu0 %v1743_v30  ;;  %578 = vmatprep.subr.bf16.mxu1 %v1818_v12  ;;  %v1833_v30 = vld [vmem:[#allocation8 + $0xe8] ss:$16 sps:$4 sm:$0xff]  }
  0x70   :  { %530 = vmatpush2.bf16.msra.mxu0 %v1745_v33  ;;  %579 = vmatpush2.bf16.msra.mxu1 %v1820_v15  ;;  %v1841_v33 = vld [vmem:[#allocation8 + $0xac] ss:$16 sps:$4 sm:$0xff]  }
  0x71   :  { %531 = vmatprep.subr.bf16.mxu0 %v1746_v34  ;;  %580 = vmatprep.subr.bf16.mxu1 %v1821_v16  ;;  %v1781_v34 = vld [vmem:[#allocation5 + $0x10] sm:$0xff]  }
  0x74   :  { %532 = vmatpush2.bf16.msra.mxu0 %v1748_v37  ;;  %581 = vmatpush2.bf16.msra.mxu1 %v1823_v19  ;;  %v1783_v37 = vld [vmem:[#allocation5 + $0x20] sm:$0xff]  }
  0x75   :  { %533 = vmatprep.subr.bf16.mxu0 %v1749_v38  ;;  %582 = vmatprep.subr.bf16.mxu1 %v1824_v20  ;;  %v1844_v38 = vld [vmem:[#allocation8 + $0x8c] ss:$16 sps:$4 sm:$0xff]  }
  0x78   :  { %534 = vmatpush2.bf16.msra.mxu0 %v1751_v41  ;;  %583 = vmatpush2.bf16.msra.mxu1 %v1826_v22  ;;  %v1847_v41 = vld [vmem:[#allocation8 + $0x6c] ss:$16 sps:$4 sm:$0xff]  }
  0x79   :  { %535 = vmatprep.subr.bf16.mxu0 %v1752_v42  ;;  %584 = vmatprep.subr.bf16.mxu1 %v1827_v23  ;;  %v1845_v42 = vld [vmem:[#allocation8 + $0x68] ss:$16 sps:$4 sm:$0xff]  }
  0x7c   :  { %536 = vmatpush2.bf16.msra.mxu0 %v1754_v45  ;;  %585 = vmatpush2.bf16.msra.mxu1 %v1829_v25  ;;  %v1853_v45 = vld [vmem:[#allocation8 + $0x2c] ss:$16 sps:$4 sm:$0xff]  }
  0x7d   :  { %875 = vmatprep.subr.bf16.mxu0 %v1757_v48  ;;  %586 = vmatprep.subr.bf16.mxu1 %v1830_v26  ;;  %v1854_v48 = vld [vmem:[#allocation8 + $0x8] ss:$16 sps:$4 sm:$0xff]  }
  0x7f   :  { %538 = vmatmul.mubr.bf16.vlgmr.msra.gmra.mxu0 %v2145_v52 }
  0x80   :  { %876 = vmatpush1.bf16.msra.mxu0 %v1755_v53  ;;  %547 = vmatprep.mubr.bf16.mxu0 %v2147_v55 }
  0x81   :  { %877 = vmatprep.subr.bf16.mxu0 %v1760_v54  ;;  %587 = vmatpush2.bf16.msra.mxu1 %v1832_v27 }
  0x82   :  { %968 = vmatprep.subr.bf16.mxu1 %v1835_v28 }
  0x84   :  { %878 = vmatpush1.bf16.msra.mxu0 %v1758_v57  ;;  %589 = vmatmul.mubr.bf16.vlgmr.msra.gmra.mxu1 %v2145_v52  ;;  %v609_v57 = vlaneseq }
  0x85   :  { %879 = vmatprep.subr.bf16.mxu0 %v1763_v60  ;;  %969 = vmatpush1.bf16.msra.mxu1 %v1833_v30 }
  0x86   :  { %598 = vmatprep.mubr.bf16.mxu1 %v2147_v55  ;;  %970 = vmatprep.subr.bf16.mxu1 %v1838_v31  ;;  %v2169_v58 = vshrl.u32 %v609_v57, 7 }
  0x87   :  { %548 = vmatmul.mubr.bf16.gmra.mxu0 %v2151_v1 }
  0x88   :  { %880 = vmatpush1.bf16.msra.mxu0 %v1761_v63  ;;  %907 = vmatprep.mubr.bf16.mxu0 %v2074_v7  ;;  %v2177_v60 = vsub.s32 0, %v2169_v58  ;;  %v2180_v61 = vsub.s32 1, %v2169_v58 }
  0x89   :  { %881 = vmatprep.subr.bf16.mxu0 %v1766_v0  ;;  %971 = vmatpush1.bf16.msra.mxu1 %v1836_v32 }
  0x8a   :  { %972 = vmatprep.subr.bf16.mxu1 %v1841_v33  ;;  %v2187_v63 = vrot.slane %v2174_v59, %v2177_v60  ;;  %v612_v0 = vrot.slane %v607_v62, %v2177_v60  ;;  %v2193_v2 = vrot.slane %v2174_v59, %v2180_v61 }
  0x8c   :  { %882 = vmatpush1.bf16.msra.mxu0 %v1764_v4  ;;  %599 = vmatmul.mubr.bf16.gmra.mxu1 %v2151_v1  ;;  %v616_v1 = vrot.slane %v607_v62, %v2180_v61 }
  0x8d   :  { %883 = vmatprep.subr.bf16.mxu0 %v1769_v5  ;;  %973 = vmatpush1.bf16.msra.mxu1 %v1839_v35 }
  0x8e   :  { %1000 = vmatprep.mubr.bf16.mxu1 %v2074_v7  ;;  %974 = vmatprep.subr.bf16.mxu1 %v1844_v38 }
  0x90   :  { %884 = vmatpush1.bf16.msra.mxu0 %v1767_v9 }
  0x91   :  { %885 = vmatprep.subr.bf16.mxu0 %v1772_v10  ;;  %975 = vmatpush1.bf16.msra.mxu1 %v1842_v39 }
  0x92   :  { %976 = vmatprep.subr.bf16.mxu1 %v1847_v41 }
  0x94   :  { %886 = vmatpush1.bf16.msra.mxu0 %v1770_v13 }
  0x95   :  { %887 = vmatprep.subr.bf16.mxu0 %v1775_v14  ;;  %977 = vmatpush1.bf16.msra.mxu1 %v1845_v42 }
  0x96   :  { %978 = vmatprep.subr.bf16.mxu1 %v1850_v44 }
  0x98   :  { %888 = vmatpush1.bf16.msra.mxu0 %v1773_v17 }
  0x99   :  { %889 = vmatprep.subr.bf16.mxu0 %v1778_v18  ;;  %979 = vmatpush1.bf16.msra.mxu1 %v1848_v43 }
  0x9a   :  { %980 = vmatprep.subr.bf16.mxu1 %v1853_v45 }
  0x9c   :  { %890 = vmatpush1.bf16.msra.mxu0 %v1776_v21 }
  0x9d   :  { %981 = vmatpush1.bf16.msra.mxu1 %v1851_v46 }
  0x9e   :  { %982 = vmatprep.subr.bf16.mxu1 %v1856_v47 }
  0x9f   :  { %908 = vmatmul.mubr.bf16.vlgmr.msra.gmra.mxu0 %v1779_v24 }
  0xa0   :  { %917 = vmatprep.mubr.bf16.mxu0 %v2074_v7 }
  0xa1   :  { %983 = vmatpush1.bf16.msra.mxu1 %v1854_v48 }
  0xa4   :  { %1001 = vmatmul.mubr.bf16.vlgmr.msra.gmra.mxu1 %v1779_v24 }
  0xa5   :  { %1010 = vmatprep.mubr.bf16.mxu1 %v2074_v7 }
  0xa7   :  { %918 = vmatmul.mubr.bf16.gmra.mxu0 %v1780_v29 }
  0xa8   :  { %927 = vmatprep.mubr.bf16.mxu0 %v2074_v7 }
  0xac   :  { %1011 = vmatmul.mubr.bf16.gmra.mxu1 %v1780_v29 }
  0xad   :  { %1020 = vmatprep.mubr.bf16.mxu1 %v2074_v7 }
  0xaf   :  { %928 = vmatmul.mubr.bf16.gmra.mxu0 %v1781_v34 }
  0xb0   :  { %937 = vmatprep.mubr.bf16.mxu0 %v2074_v7 }
  0xb4   :  { %1021 = vmatmul.mubr.bf16.gmra.mxu1 %v1781_v34 }
  0xb5   :  { %1030 = vmatprep.mubr.bf16.mxu1 %v2074_v7 }
  0xb7   :  { %938 = vmatmul.mubr.bf16.gmra.mxu0 %v1782_v36 }
  0xb8   :  { %947 = vmatprep.mubr.bf16.mxu0 %v2074_v7 }
  0xbc   :  { %1031 = vmatmul.mubr.bf16.gmra.mxu1 %v1782_v36 }
  0xbd   :  { %1040 = vmatprep.mubr.bf16.mxu1 %v2074_v7 }
  0xbf   :  { %948 = vmatmul.mubr.bf16.gmra.mxu0 %v1783_v37 }
  0xc0   :  { %957 = vmatprep.mubr.bf16.mxu0 %v2074_v7 }
  0xc4   :  { %1041 = vmatmul.mubr.bf16.gmra.mxu1 %v1783_v37 }
  0xc5   :  { %1050 = vmatprep.mubr.bf16.mxu1 %v2074_v7 }
  0xc7   :  { %958 = vmatmul.mubr.bf16.gmra.mxu0 %v1784_v40 }
  0xcc   :  { %1051 = vmatmul.mubr.bf16.gmra.mxu1 %v1784_v40 }
 0x13f   :  { %v539_v49 = vpop.f32.mrf.mxu0 }
 0x140   :  { %v2196_v6 = vadd.f32 %v612_v0, %v539_v49 }
 0x141   :  { %v541_v50 = vpop.f32.mrf.mxu0 }
 0x142   :  { %v2198_v7 = vadd.f32 %v616_v1, %v541_v50 }
 0x143   :  { %v543_v51 = vpop.f32.mrf.mxu0 }
 0x144   :  { %v2204_v14 = vadd.f32 %v612_v0, %v543_v51 }
 0x145   :  { %v545_v52 = vpop.f32.mrf.mxu0 }
 0x146   :  { %v2206_v15 = vadd.f32 %v616_v1, %v545_v52 }
 0x147   :  { %v549_v53 = vpop.f32.mrf.mxu0 }
 0x148   :  { %v2212_v23 = vadd.f32 %v612_v0, %v549_v53  ;;  %v2236_v0 = vpop.f32.mrf.mxu1 }
 0x149   :  { %v551_v54 = vpop.f32.mrf.mxu0 }
 0x14a   :  { %v2214_v24 = vadd.f32 %v616_v1, %v551_v54 }
 0x14b   :  { %v553_v55 = vpop.f32.mrf.mxu0 }
 0x14d   :  { %v554_v56 = vpop.f32.mrf.mxu0 }
 0x15f   :  { %v909_v3 = vpop.f32.mrf.mxu0 }
 0x160   :  { %v910_v4 = vadd.f32 %v909_v3, %v2187_v63 }
 0x161   :  { %v911_v5 = vpop.f32.mrf.mxu0 }
 0x162   :  { %v912_v8 = vadd.f32 %v911_v5, %v2193_v2  ;;  %v1061_v11 = vmul.f32 %v910_v4, %v2196_v6 }
 0x163   :  { %v913_v9 = vpop.f32.mrf.mxu0 }
 0x164   :  { %v914_v10 = vadd.f32 %v913_v9, %v2187_v63  ;;  %v1062_v12 = vmul.f32 %v912_v8, %v2198_v7 }
 0x165   :  { %v915_v13 = vpop.f32.mrf.mxu0 }
 0x166   :  { %v916_v16 = vadd.f32 %v915_v13, %v2193_v2  ;;  %v1067_v17 = vadd.f32 %v1062_v12, %v1061_v11  ;;  %v1063_v19 = vmul.f32 %v914_v10, %v2204_v14  ;;  %v2241_v10 = vpop.f32.mrf.mxu1 }
 0x167   :  { %v919_v18 = vpop.f32.mrf.mxu0 }
 0x168   :  { %v1064_v20 = vmul.f32 %v916_v16, %v2206_v15  ;;  %v920_v21 = vadd.f32 %v919_v18, %v2187_v63  ;;  %1068 = vadd.xlane.f32.xlu0 %v1067_v17  ;;  %v2244_v17 = vpop.f32.mrf.mxu1 }
 0x169   :  { %v921_v22 = vpop.f32.mrf.mxu0 }
 0x16a   :  { %v922_v25 = vadd.f32 %v921_v22, %v2193_v2  ;;  %v1070_v26 = vadd.f32 %v1064_v20, %v1063_v19  ;;  %v1065_v28 = vmul.f32 %v920_v21, %v2212_v23 }
 0x16b   :  { %v923_v27 = vpop.f32.mrf.mxu0 }
 0x16c   :  { %v1066_v29 = vmul.f32 %v922_v25, %v2214_v24  ;;  %v924_v30 = vadd.f32 %v923_v27, %v2187_v63  ;;  %1071 = vadd.xlane.f32.xlu0 %v1070_v26 }
 0x16d   :  { %v925_v31 = vpop.f32.mrf.mxu0 }
 0x16e   :  { %v926_v32 = vadd.f32 %v925_v31, %v2193_v2  ;;  %v1073_v33 = vadd.f32 %v1066_v29, %v1065_v28  ;;  %v1076_v36 = vmul.f32 %v924_v30, %v2196_v6  ;;  %v2252_v28 = vpop.f32.mrf.mxu1 }
 0x16f   :  { %v929_v34 = vpop.f32.mrf.mxu0  ;;  %2365 = vst [vmem:[#allocation16_spill] sm:$0xff] %v2252_v28 }
 0x170   :  { %v930_v35 = vadd.f32 %v929_v34, %v2187_v63  ;;  %1074 = vadd.xlane.f32.xlu0 %v1073_v33  ;;  %v1077_v37 = vmul.f32 %v926_v32, %v2198_v7  ;;  %v2256_v33 = vpop.f32.mrf.mxu1 }
 0x171   :  { %v931_v38 = vpop.f32.mrf.mxu0 }
 0x172   :  { %v932_v39 = vadd.f32 %v931_v38, %v2193_v2  ;;  %v1082_v40 = vadd.f32 %v1077_v37, %v1076_v36  ;;  %v1078_v42 = vmul.f32 %v930_v35, %v2204_v14  ;;  %v1859_v38 = vld [vmem:[#allocation10 + $0x74] ss:$8 sps:$4 sm:$0xff]  }
 0x173   :  { %v933_v41 = vpop.f32.mrf.mxu0  ;;  %1428 = vmatprep.subr.bf16.mxu0 %v1859_v38  ;;  %1662 = vmatprep.subr.bf16.mxu1 %v1859_v38 }
 0x174   :  { %v1079_v43 = vmul.f32 %v932_v39, %v2206_v15  ;;  %v934_v44 = vadd.f32 %v933_v41, %v2187_v63  ;;  %1083 = vadd.xlane.f32.xlu1 %v1082_v40 }
 0x175   :  { %v935_v45 = vpop.f32.mrf.mxu0 }
 0x176   :  { %v936_v46 = vadd.f32 %v935_v45, %v2193_v2  ;;  %v1085_v47 = vadd.f32 %v1079_v43, %v1078_v42  ;;  %v1080_v49 = vmul.f32 %v934_v44, %v2212_v23  ;;  %v2263_v42 = vpop.f32.mrf.mxu1  ;;  %v1857_v43 = vld [vmem:[#allocation10 + $0x70] ss:$8 sps:$4 sm:$0xff]   ;;  %v1862_v44 = vld [vmem:[#allocation10 + $0x64] ss:$8 sps:$4 sm:$0xff]  }
 0x177   :  { %v939_v48 = vpop.f32.mrf.mxu0  ;;  %2366 = vst [vmem:[#allocation17_spill] sm:$0xff] %v2263_v42  ;;  %1429 = vmatpush1.bf16.msra.mxu0 %v1857_v43  ;;  %1678 = vmatpush1.bf16.msra.mxu1 %v1857_v43 }
 0x178   :  { %v1081_v50 = vmul.f32 %v936_v46, %v2214_v24  ;;  %v940_v51 = vadd.f32 %v939_v48, %v2187_v63  ;;  %1086 = vadd.xlane.f32.xlu1 %v1085_v47  ;;  %1430 = vmatprep.subr.bf16.mxu0 %v1862_v44  ;;  %v1865_v47 = vld [vmem:[#allocation10 + $0x54] ss:$8 sps:$4 sm:$0xff]   ;;  %v1863_v48 = vld [vmem:[#allocation10 + $0x50] ss:$8 sps:$4 sm:$0xff]  }
 0x179   :  { %v941_v52 = vpop.f32.mrf.mxu0  ;;  %1663 = vmatprep.subr.bf16.mxu1 %v1862_v44 }
 0x17a   :  { %v942_v53 = vadd.f32 %v941_v52, %v2193_v2  ;;  %v1088_v54 = vadd.f32 %v1081_v50, %v1080_v49  ;;  %v1091_v56 = vmul.f32 %v940_v51, %v2196_v6  ;;  %v1871_v49 = vld [vmem:[#allocation10 + $0x34] ss:$8 sps:$4 sm:$0xff]   ;;  %v1869_v50 = vld [vmem:[#allocation10 + $0x30] ss:$8 sps:$4 sm:$0xff]   ;;  %v1874_v51 = vld [vmem:[#allocation10 + $0x24] ss:$8 sps:$4 sm:$0xff]  }
 0x17b   :  { %v943_v55 = vpop.f32.mrf.mxu0  ;;  %v1872_v52 = vld [vmem:[#allocation10 + $0x20] ss:$8 sps:$4 sm:$0xff]  }
 0x17c   :  { %v1092_v57 = vmul.f32 %v942_v53, %v2198_v7  ;;  %v944_v62 = vadd.f32 %v943_v55, %v2187_v63  ;;  %1089 = vadd.xlane.f32.xlu1 %v1088_v54  ;;  %v1877_v53 = vld [vmem:[#allocation10 + $0x14] ss:$8 sps:$4 sm:$0xff]   ;;  %v1875_v54 = vld [vmem:[#allocation10 + $0x10] ss:$8 sps:$4 sm:$0xff]   ;;  %v1880_v55 = vld [vmem:[#allocation10 + $0x4] ss:$8 sps:$4 sm:$0xff]  }
 0x17d   :  { %v945_v1 = vpop.f32.mrf.mxu0 }
 0x17e   :  { %v946_v3 = vadd.f32 %v945_v1, %v2193_v2  ;;  %v1097_v4 = vadd.f32 %v1092_v57, %v1091_v56  ;;  %v1093_v8 = vmul.f32 %v944_v62, %v2204_v14  ;;  %v1878_v56 = vld [vmem:[#allocation10] ss:$8 sps:$4 sm:$0xff]   ;;  %v1883_v57 = vld [vmem:[#allocation10 + $0xf4] ss:$8 sps:$4 sm:$0xff]   ;;  %v1881_v62 = vld [vmem:[#allocation10 + $0xf0] ss:$8 sps:$4 sm:$0xff]  }
 0x17f   :  { %v949_v5 = vpop.f32.mrf.mxu0  ;;  %v1886_v1 = vld [vmem:[#allocation10 + $0xe4] ss:$8 sps:$4 sm:$0xff]  }
 0x180   :  { %v1094_v9 = vmul.f32 %v946_v3, %v2206_v15  ;;  %1098 = vadd.xlane.f32.xlu0 %v1097_v4  ;;  %v950_v22 = vadd.f32 %v949_v5, %v2187_v63  ;;  %v1884_v3 = vld [vmem:[#allocation10 + $0xe0] ss:$8 sps:$4 sm:$0xff]   ;;  %v1889_v4 = vld [vmem:[#allocation10 + $0xd4] ss:$8 sps:$4 sm:$0xff]   ;;  %v1887_v5 = vld [vmem:[#allocation10 + $0xd0] ss:$8 sps:$4 sm:$0xff]  }
 0x181   :  { %v951_v11 = vpop.f32.mrf.mxu0 }
 0x182   :  { %v1100_v12 = vadd.f32 %v1094_v9, %v1093_v8  ;;  %v952_v19 = vadd.f32 %v951_v11, %v2193_v2  ;;  %v1095_v35 = vmul.f32 %v950_v22, %v2212_v23  ;;  %v1892_v8 = vld [vmem:[#allocation10 + $0xc4] ss:$8 sps:$4 sm:$0xff]   ;;  %v1890_v9 = vld [vmem:[#allocation10 + $0xc0] ss:$8 sps:$4 sm:$0xff]   ;;  %v1895_v11 = vld [vmem:[#allocation10 + $0xb4] ss:$8 sps:$4 sm:$0xff]  }
 0x183   :  { %v953_v13 = vpop.f32.mrf.mxu0 }
 0x184   :  { %v954_v16 = vadd.f32 %v953_v13, %v2187_v63  ;;  %1101 = vadd.xlane.f32.xlu1 %v1100_v12  ;;  %v1096_v30 = vmul.f32 %v952_v19, %v2214_v24  ;;  %v1893_v12 = vld [vmem:[#allocation10 + $0xb0] ss:$8 sps:$4 sm:$0xff]   ;;  %v1898_v13 = vld [vmem:[#allocation10 + $0xa4] ss:$8 sps:$4 sm:$0xff]  }
 0x185   :  { %v955_v18 = vpop.f32.mrf.mxu0  ;;  %v1899_v19 = vld [vmem:[#allocation10 + $0x90] ss:$8 sps:$4 sm:$0xff]  }
 0x186   :  { %v956_v20 = vadd.f32 %v955_v18, %v2193_v2  ;;  %v1106_v25 = vmul.f32 %v954_v16, %v2196_v6  ;;  %v1103_v41 = vadd.f32 %v1096_v30, %v1095_v35  ;;  %v1896_v16 = vld [vmem:[#allocation10 + $0xa0] ss:$8 sps:$4 sm:$0xff]   ;;  %v1901_v18 = vld [vmem:[#allocation10 + $0x94] ss:$8 sps:$4 sm:$0xff]  }
 0x187   :  { %v959_v21 = vpop.f32.mrf.mxu0 }
 0x188   :  { %v1107_v26 = vmul.f32 %v956_v20, %v2198_v7  ;;  %v960_v27 = vadd.f32 %v959_v21, %v2187_v63  ;;  %v1904_v20 = vld [vmem:[#allocation10 + $0x84] ss:$8 sps:$4 sm:$0xff]   ;;  %v1902_v21 = vld [vmem:[#allocation10 + $0x80] ss:$8 sps:$4 sm:$0xff]  }
 0x189   :  { %v961_v29 = vpop.f32.mrf.mxu0 }
 0x18a   :  { %v962_v31 = vadd.f32 %v961_v29, %v2193_v2  ;;  %v1112_v32 = vadd.f32 %v1107_v26, %v1106_v25  ;;  %v1108_v36 = vmul.f32 %v960_v27, %v2204_v14 }
 0x18b   :  { %v963_v34 = vpop.f32.mrf.mxu0 }
 0x18c   :  { %v1109_v6 = vmul.f32 %v962_v31, %v2206_v15  ;;  %v964_v7 = vadd.f32 %v963_v34, %v2187_v63  ;;  %1113 = vadd.xlane.f32.xlu0 %v1112_v32  ;;  %v604_v63 = vpop.f32.mrf.mxu1  ;;  %v1860_v15 = vld [vmem:[#allocation10 + $0x60] ss:$8 sps:$4 sm:$0xff]  }
 0x18d   :  { %v965_v37 = vpop.f32.mrf.mxu0  ;;  %1431 = vmatpush1.bf16.msra.mxu0 %v1860_v15  ;;  %1679 = vmatpush1.bf16.msra.mxu1 %v1860_v15 }
 0x18e   :  { %v966_v39 = vadd.f32 %v965_v37, %v2193_v2  ;;  %v1115_v40 = vadd.f32 %v1109_v6, %v1108_v36  ;;  %v1110_v45 = vmul.f32 %v964_v7, %v2212_v23  ;;  %v605_v2 = vpop.f32.mrf.mxu1  ;;  %1432 = vmatprep.subr.bf16.mxu0 %v1865_v47  ;;  %1664 = vmatprep.subr.bf16.mxu1 %v1865_v47  ;;  %v1868_v23 = vld [vmem:[#allocation10 + $0x44] ss:$8 sps:$4 sm:$0xff]  }
 0x190   :  { %v1111_v14 = vmul.f32 %v966_v39, %v2214_v24  ;;  %1116 = vadd.xlane.f32.xlu1 %v1115_v40  ;;  %1104 = vadd.xlane.f32.xlu0 %v1103_v41  ;;  %v1866_v24 = vld [vmem:[#allocation10 + $0x40] ss:$8 sps:$4 sm:$0xff]   ;;  %v2267_v22 = vpop.f32.mrf.mxu1 }
 0x191   :  { %1433 = vmatpush1.bf16.msra.mxu0 %v1863_v48  ;;  %1680 = vmatpush1.bf16.msra.mxu1 %v1863_v48 }
 0x192   :  { %v1118_v46 = vadd.f32 %v1111_v14, %v1110_v45  ;;  %1434 = vmatprep.subr.bf16.mxu0 %v1868_v23  ;;  %1665 = vmatprep.subr.bf16.mxu1 %v1868_v23  ;;  %v2269_v25 = vpop.f32.mrf.mxu1 }
 0x194   :  { %1119 = vadd.xlane.f32.xlu1 %v1118_v46  ;;  %v2271_v26 = vpop.f32.mrf.mxu1 }
 0x195   :  { %1435 = vmatpush1.bf16.msra.mxu0 %v1866_v24  ;;  %1681 = vmatpush1.bf16.msra.mxu1 %v1866_v24 }
 0x196   :  { %1436 = vmatprep.subr.bf16.mxu0 %v1871_v49  ;;  %1666 = vmatprep.subr.bf16.mxu1 %v1871_v49  ;;  %v2273_v27 = vpop.f32.mrf.mxu1 }
 0x198   :  { %v2275_v29 = vpop.f32.mrf.mxu1 }
 0x199   :  { %1437 = vmatpush1.bf16.msra.mxu0 %v1869_v50  ;;  %1682 = vmatpush1.bf16.msra.mxu1 %v1869_v50 }
 0x19a   :  { %1438 = vmatprep.subr.bf16.mxu0 %v1874_v51  ;;  %1667 = vmatprep.subr.bf16.mxu1 %v1874_v51  ;;  %v2277_v30 = vpop.f32.mrf.mxu1 }
 0x19c   :  { %v2279_v31 = vpop.f32.mrf.mxu1 }
 0x19d   :  { %1439 = vmatpush1.bf16.msra.mxu0 %v1872_v52  ;;  %1683 = vmatpush1.bf16.msra.mxu1 %v1872_v52 }
 0x19e   :  { %1440 = vmatprep.subr.bf16.mxu0 %v1877_v53  ;;  %1668 = vmatprep.subr.bf16.mxu1 %v1877_v53  ;;  %v2281_v32 = vpop.f32.mrf.mxu1 }
 0x1a0   :  { %v2283_v35 = vpop.f32.mrf.mxu1 }
 0x1a1   :  { %1441 = vmatpush1.bf16.msra.mxu0 %v1875_v54  ;;  %1684 = vmatpush1.bf16.msra.mxu1 %v1875_v54 }
 0x1a2   :  { %1442 = vmatprep.subr.bf16.mxu0 %v1880_v55  ;;  %1669 = vmatprep.subr.bf16.mxu1 %v1880_v55  ;;  %v2285_v7 = vpop.f32.mrf.mxu1 }
 0x1a4   :  { %v2287_v38 = vpop.f32.mrf.mxu1 }
 0x1a5   :  { %1443 = vmatpush1.bf16.msra.mxu0 %v1878_v56  ;;  %1685 = vmatpush1.bf16.msra.mxu1 %v1878_v56 }
 0x1a6   :  { %1444 = vmatprep.subr.bf16.mxu0 %v1883_v57  ;;  %1670 = vmatprep.subr.bf16.mxu1 %v1883_v57  ;;  %v2289_v40 = vpop.f32.mrf.mxu1 }
 0x1a8   :  { %v2291_v45 = vpop.f32.mrf.mxu1 }
 0x1a9   :  { %1445 = vmatpush2.bf16.msra.mxu0 %v1881_v62  ;;  %1686 = vmatpush2.bf16.msra.mxu1 %v1881_v62 }
 0x1aa   :  { %1446 = vmatprep.subr.bf16.mxu0 %v1886_v1  ;;  %1671 = vmatprep.subr.bf16.mxu1 %v1886_v1  ;;  %v2293_v48 = vpop.f32.mrf.mxu1 }
 0x1ac   :  { %v2295_v1 = vpop.f32.mrf.mxu1 }
 0x1ad   :  { %1447 = vmatpush2.bf16.msra.mxu0 %v1884_v3  ;;  %1687 = vmatpush2.bf16.msra.mxu1 %v1884_v3 }
 0x1ae   :  { %1448 = vmatprep.subr.bf16.mxu0 %v1889_v4  ;;  %1672 = vmatprep.subr.bf16.mxu1 %v1889_v4 }
 0x1b1   :  { %1449 = vmatpush2.bf16.msra.mxu0 %v1887_v5  ;;  %1688 = vmatpush2.bf16.msra.mxu1 %v1887_v5 }
 0x1b2   :  { %1450 = vmatprep.subr.bf16.mxu0 %v1892_v8  ;;  %1673 = vmatprep.subr.bf16.mxu1 %v1892_v8 }
 0x1b5   :  { %1451 = vmatpush2.bf16.msra.mxu0 %v1890_v9  ;;  %1689 = vmatpush2.bf16.msra.mxu1 %v1890_v9 }
 0x1b6   :  { %1452 = vmatprep.subr.bf16.mxu0 %v1895_v11  ;;  %1674 = vmatprep.subr.bf16.mxu1 %v1895_v11 }
 0x1b9   :  { %1453 = vmatpush2.bf16.msra.mxu0 %v1893_v12  ;;  %1690 = vmatpush2.bf16.msra.mxu1 %v1893_v12 }
 0x1ba   :  { %1454 = vmatprep.subr.bf16.mxu0 %v1898_v13  ;;  %1675 = vmatprep.subr.bf16.mxu1 %v1898_v13 }
 0x1bd   :  { %1455 = vmatpush2.bf16.msra.mxu0 %v1896_v16  ;;  %1691 = vmatpush2.bf16.msra.mxu1 %v1896_v16 }
 0x1be   :  { %1456 = vmatprep.subr.bf16.mxu0 %v1901_v18  ;;  %1676 = vmatprep.subr.bf16.mxu1 %v1901_v18 }
 0x1c1   :  { %1457 = vmatpush2.bf16.msra.mxu0 %v1899_v19  ;;  %1692 = vmatpush2.bf16.msra.mxu1 %v1899_v19  ;;  %v2297_v19 = vpop.f32.mrf.mxu1 }
 0x1c2   :  { %1458 = vmatprep.subr.bf16.mxu0 %v1904_v20  ;;  %1677 = vmatprep.subr.bf16.mxu1 %v1904_v20 }
 0x1c5   :  { %1459 = vmatpush2.bf16.msra.mxu0 %v1902_v21  ;;  %1693 = vmatpush2.bf16.msra.mxu1 %v1902_v21 }
 0x1f1   :  { %v1069_v34 = vpop.xlane.xlu0 %1068 }
 0x1f5   :  { %v1072_v6 = vpop.xlane.xlu0 %1071 }
 0x1f9   :  { %v1075_v39 = vpop.xlane.xlu0 %1074 }
 0x1fd   :  { %v1084_v36 = vpop.xlane.xlu1 %1083 }
 0x1fe   :  { %v1121_v44 = vmax.f32 %v1069_v34, %v1084_v36 }
 0x201   :  { %v1087_v37 = vpop.xlane.xlu1 %1086 }
 0x202   :  { %v1122_v15 = vmax.f32 %v1072_v6, %v1087_v37 }
 0x205   :  { %v1090_v41 = vpop.xlane.xlu1 %1089 }
 0x206   :  { %v1123_v57 = vmax.f32 %v1075_v39, %v1090_v41 }
 0x209   :  { %v1099_v43 = vpop.xlane.xlu0 %1098 }
 0x20a   :  { %v1124_v14 = vmax.f32 %v1121_v44, %v1099_v43  ;;  %v1042_v44 = vpop.f32.mrf.mxu1 }
 0x20d   :  { %v1102_v63 = vpop.xlane.xlu1 %1101 }
 0x20e   :  { %v1125_v47 = vmax.f32 %v1122_v15, %v1102_v63  ;;  %v1044_v15 = vpop.f32.mrf.mxu1 }
 0x215   :  { %v1114_v46 = vpop.xlane.xlu0 %1113 }
 0x216   :  { %v1127_v2 = vmax.f32 %v1124_v14, %v1114_v46 }
 0x218   :  { %v1130_v23 = vsub.f32 %v1069_v34, %v1127_v2  ;;  %v1139_v24 = vsub.f32 %v1084_v36, %v1127_v2  ;;  %v1148_v49 = vsub.f32 %v1099_v43, %v1127_v2  ;;  %v1157_v50 = vsub.f32 %v1114_v46, %v1127_v2 }
 0x219   :  { %v1117_v51 = vpop.xlane.xlu1 %1116  ;;  %v1105_v56 = vpop.xlane.xlu0 %1104 }
 0x21a   :  { %v1133_v52 = vmul.f32 1.442695, %v1130_v23  ;;  %v1142_v53 = vmul.f32 1.442695, %v1139_v24  ;;  %v1151_v54 = vmul.f32 1.442695, %v1148_v49  ;;  %v1128_v55 = vmax.f32 %v1125_v47, %v1117_v51 }
 0x21b   :  { %v1160_v62 = vmul.f32 1.442695, %v1157_v50  ;;  %v1126_v9 = vmax.f32 %v1123_v57, %v1105_v56 }
 0x21c   :  { %1905 = vpow2.f32 %v1133_v52  ;;  %v1131_v3 = vsub.f32 %v1072_v6, %v1128_v55  ;;  %v1140_v4 = vsub.f32 %v1087_v37, %v1128_v55  ;;  %v1149_v5 = vsub.f32 %v1102_v63, %v1128_v55 }
 0x21d   :  { %1907 = vpow2.f32 %v1142_v53  ;;  %v1158_v8 = vsub.f32 %v1117_v51, %v1128_v55  ;;  %v1120_v11 = vpop.xlane.xlu1 %1119 }
 0x21e   :  { %1909 = vpow2.f32 %v1151_v54  ;;  %v1135_v12 = vmul.f32 1.442695, %v1131_v3  ;;  %v1144_v13 = vmul.f32 1.442695, %v1140_v4  ;;  %v1153_v16 = vmul.f32 1.442695, %v1149_v5 }
 0x21f   :  { %1911 = vpow2.f32 %v1160_v62  ;;  %v1129_v18 = vmax.f32 %v1126_v9, %v1120_v11  ;;  %v1162_v20 = vmul.f32 1.442695, %v1158_v8  ;;  %v669_v3 = vsub.s32 2, %v2169_v58 }
 0x220   :  { %1913 = vpow2.f32 %v1135_v12  ;;  %v673_v4 = vsub.s32 3, %v2169_v58 }
 0x221   :  { %1915 = vpow2.f32 %v1144_v13  ;;  %v1132_v21 = vsub.f32 %v1075_v39, %v1129_v18  ;;  %v1141_v34 = vsub.f32 %v1090_v41, %v1129_v18  ;;  %v1150_v36 = vsub.f32 %v1105_v56, %v1129_v18  ;;  %v1046_v39 = vpop.f32.mrf.mxu1 }
 0x222   :  { %v1159_v6 = vsub.f32 %v1120_v11, %v1129_v18  ;;  %1917 = vpow2.f32 %v1153_v16  ;;  %v670_v16 = vrot.slane %v2174_v59, %v669_v3  ;;  %v674_v18 = vrot.slane %v2174_v59, %v673_v4 }
 0x223   :  { %v1137_v37 = vmul.f32 1.442695, %v1132_v21  ;;  %v1146_v43 = vmul.f32 1.442695, %v1141_v34  ;;  %1919 = vpow2.f32 %v1162_v20  ;;  %v1155_v14 = vmul.f32 1.442695, %v1150_v36  ;;  %v1048_v53 = vpop.f32.mrf.mxu1 }
 0x224   :  { %v1164_v63 = vmul.f32 1.442695, %v1159_v6  ;;  %v1003_v58 = vadd.f32 %v2267_v22, %v670_v16  ;;  %v1005_v34 = vadd.f32 %v2269_v25, %v674_v18  ;;  %v1007_v36 = vadd.f32 %v2271_v26, %v670_v16 }
 0x225   :  { %1921 = vpow2.f32 %v1137_v37  ;;  %v1052_v8 = vpop.f32.mrf.mxu1  ;;  %v1009_v6 = vadd.f32 %v2273_v27, %v674_v18  ;;  %v1019_v59 = vadd.f32 %v2281_v32, %v674_v18  ;;  %v1027_v22 = vadd.f32 %v2287_v38, %v670_v16 }
 0x226   :  { %1923 = vpow2.f32 %v1146_v43  ;;  %v1013_v43 = vadd.f32 %v2275_v29, %v670_v16  ;;  %v1029_v25 = vadd.f32 %v2289_v40, %v674_v18  ;;  %v1033_v27 = vadd.f32 %v2291_v45, %v670_v16 }
 0x227   :  { %1925 = vpow2.f32 %v1155_v14  ;;  %v1054_v20 = vpop.f32.mrf.mxu1  ;;  %v1015_v14 = vadd.f32 %v2277_v30, %v674_v18  ;;  %v1037_v29 = vadd.f32 %v2295_v1, %v670_v16  ;;  %v1039_v30 = vadd.f32 %v2297_v19, %v674_v18 }
 0x228   :  { %1927 = vpow2.f32 %v1164_v63  ;;  %v1017_v63 = vadd.f32 %v2279_v31, %v670_v16  ;;  %v1043_v32 = vadd.f32 %v1042_v44, %v670_v16  ;;  %v1049_v4 = vadd.f32 %v1048_v53, %v674_v18 }
 0x229   :  { %v1906_v46 = vpop.eup %1905  ;;  %v1056_v37 = vpop.f32.mrf.mxu1  ;;  %v1053_v38 = vadd.f32 %v1052_v8, %v670_v16 }
 0x22a   :  { %v1908_v2 = vpop.eup %1907  ;;  %v1057_v42 = vadd.f32 %v1056_v37, %v670_v16 }
 0x22b   :  { %v1910_v47 = vpop.eup %1909  ;;  %v1166_v23 = vadd.f32 %v1908_v2, %v1906_v46 }
 0x22c   :  { %v1912_v41 = vpop.eup %1911 }
 0x22d   :  { %v1914_v24 = vpop.eup %1913  ;;  %v1169_v49 = vadd.f32 %v1910_v47, %v1166_v23  ;;  %v1023_v23 = vadd.f32 %v2283_v35, %v670_v16  ;;  %v1058_v35 = vpop.f32.mrf.mxu1 }
 0x22e   :  { %v2299_v50 = vpop.eup %1915  ;;  %v1059_v1 = vadd.f32 %v1058_v35, %v674_v18 }
 0x22f   :  { %v1172_v51 = vadd.f32 %v1912_v41, %v1169_v49  ;;  %v1167_v52 = vadd.f32 %v2299_v50, %v1914_v24  ;;  %v1918_v54 = vpop.eup %1917  ;;  %v1025_v49 = vadd.f32 %v2285_v7, %v674_v18  ;;  %v1047_v7 = vadd.f32 %v1046_v39, %v670_v16 }
 0x230   :  { %v1920_v55 = vpop.eup %1919 }
 0x231   :  { %1929 = vrcp.f32 %v1172_v51  ;;  %v1170_v56 = vadd.f32 %v1918_v54, %v1167_v52  ;;  %v1035_v51 = vadd.f32 %v2293_v48, %v674_v18  ;;  %v1055_v48 = vadd.f32 %v1054_v20, %v674_v18 }
 0x232   :  { %v2302_v57 = vpop.eup %1921 }
 0x233   :  { %v2304_v62 = vpop.eup %1923  ;;  %v1173_v5 = vadd.f32 %v1920_v55, %v1170_v56  ;;  %v1045_v56 = vadd.f32 %v1044_v15, %v674_v18 }
 0x234   :  { %v1168_v9 = vadd.f32 %v2304_v62, %v2302_v57  ;;  %v2310_v11 = vpop.eup %1925 }
 0x235   :  { %1931 = vrcp.f32 %v1173_v5  ;;  %v2313_v13 = vpop.eup %1927 }
 0x236   :  { %v1171_v12 = vadd.f32 %v2310_v11, %v1168_v9 }
 0x238   :  { %v1174_v21 = vadd.f32 %v2313_v13, %v1171_v12 }
 0x23a   :  { %1933 = vrcp.f32 %v1174_v21 }
 0x23e   :  { %v1930_v26 = vpop.eup %1929 }
 0x23f   :  { %v1178_v31 = vmul.f32 %v1930_v26, %v1906_v46  ;;  %v1187_v52 = vmul.f32 %v1930_v26, %v1908_v2  ;;  %v1202_v3 = vmul.f32 %v1930_v26, %v1910_v47  ;;  %v1217_v21 = vmul.f32 %v1930_v26, %v1912_v41 }
 0x241   :  { %v1182_v5 = vmul.f32 %v1178_v31, %v1005_v34  ;;  %v1181_v40 = vmul.f32 %v1178_v31, %v1003_v58  ;;  %v1190_v9 = vmul.f32 %v1187_v52, %v1017_v63  ;;  %v1191_v12 = vmul.f32 %v1187_v52, %v1019_v59 }
 0x242   :  { %v1932_v45 = vpop.eup %1931  ;;  %v1205_v15 = vmul.f32 %v1202_v3, %v1033_v27  ;;  %v1206_v2 = vmul.f32 %v1202_v3, %v1035_v51  ;;  %v1220_v31 = vmul.f32 %v1217_v21, %v1047_v7  ;;  %v1221_v41 = vmul.f32 %v1217_v21, %v1049_v4 }
 0x243   :  { %v1179_v28 = vmul.f32 %v1932_v45, %v1914_v24  ;;  %v1196_v19 = vadd.f32 %v1190_v9, %v1181_v40  ;;  %v1197_v46 = vadd.f32 %v1191_v12, %v1182_v5  ;;  %v1188_v44 = vmul.f32 %v1932_v45, %v2299_v50 }
 0x244   :  { %v1203_v47 = vmul.f32 %v1932_v45, %v1918_v54  ;;  %v1218_v39 = vmul.f32 %v1932_v45, %v1920_v55 }
 0x245   :  { %v1184_v53 = vmul.f32 %v1179_v28, %v1009_v6  ;;  %v1183_v8 = vmul.f32 %v1179_v28, %v1007_v36  ;;  %v1192_v34 = vmul.f32 %v1188_v44, %v1023_v23  ;;  %v1193_v58 = vmul.f32 %v1188_v44, %v1025_v49 }
 0x246   :  { %v1211_v63 = vadd.f32 %v1205_v15, %v1196_v19  ;;  %v1212_v59 = vadd.f32 %v1206_v2, %v1197_v46  ;;  %v1207_v24 = vmul.f32 %v1203_v47, %v1037_v29  ;;  %v1208_v37 = vmul.f32 %v1203_v47, %v1039_v30 }
 0x247   :  { %v1934_v20 = vpop.eup %1933  ;;  %v1198_v16 = vadd.f32 %v1192_v34, %v1183_v8  ;;  %v1199_v18 = vadd.f32 %v1193_v58, %v1184_v53  ;;  %v1222_v55 = vmul.f32 %v1218_v39, %v1053_v38  ;;  %v1223_v36 = vmul.f32 %v1218_v39, %v1055_v48  ;;  %v2367_v39 = vld [vmem:[#allocation16_spill] sm:$0xff]  ;;  %v2368_v8 = vld [vmem:[#allocation17_spill] sm:$0xff] }
 0x248   :  { %v1180_v26 = vmul.f32 %v1934_v20, %v2302_v57  ;;  %v1189_v50 = vmul.f32 %v1934_v20, %v2304_v62  ;;  %v1204_v54 = vmul.f32 %v1934_v20, %v2310_v11  ;;  %v1219_v23 = vmul.f32 %v1934_v20, %v2313_v13 }
 0x249   :  { %v1213_v6 = vadd.f32 %v1207_v24, %v1198_v16  ;;  %v1214_v28 = vadd.f32 %v1208_v37, %v1199_v18  ;;  %v1226_v35 = vadd.f32 %v1220_v31, %v1211_v63  ;;  %v1227_v3 = vadd.f32 %v1221_v41, %v1212_v59 }
 0x24a   :  { %v1186_v49 = vmul.f32 %v1180_v26, %v1015_v14  ;;  %v1185_v27 = vmul.f32 %v1180_v26, %v1013_v43  ;;  %v1194_v51 = vmul.f32 %v1189_v50, %v1027_v22  ;;  %v1195_v52 = vmul.f32 %v1189_v50, %v1029_v25  ;;  %v1485_v25 = vld [vmem:[%s2363_s7] sm:$0x3]  ;;  %s2075_s7 = smov [#allocation11]  }
 0x24b   :  { %v1228_v29 = vadd.f32 %v1222_v55, %v1213_v6  ;;  %v1229_v30 = vadd.f32 %v1223_v36, %v1214_v28  ;;  %v1209_v4 = vmul.f32 %v1204_v54, %v1043_v32  ;;  %v1210_v62 = vmul.f32 %v1204_v54, %v1045_v56  ;;  %s1514_s13 = sshll.u32 %s2075_s7, 4  ;;  %s1515_s13 = int_to_ptr.vmem [resolvable:$true] %s1514_s13 }
 0x24c   :  { %v1200_v7 = vadd.f32 %v1194_v51, %v1185_v27  ;;  %v1201_v57 = vadd.f32 %v1195_v52, %v1186_v49  ;;  %v1224_v9 = vmul.f32 %v1219_v23, %v1057_v42  ;;  %v1225_v12 = vmul.f32 %v1219_v23, %v1059_v1  ;;  %s2035_s14 = scalar_lea.vmem %s1515_s13, 768  ;;  %p2040_p12 = scmp.lt.s32.totalorder %s1515_s13, %s1515_s13 }
 0x24d   :  { %v1232_v5 = vpack.c.bf16 %v1228_v29, %v1226_v35  ;;  %v1233_v11 = vpack.c.bf16 %v1229_v30, %v1227_v3  ;;  %v1490_v32 = vrot.slane %v1485_v25, %v2177_v60  ;;  %v1494_v42 = vrot.slane %v1485_v25, %v2180_v61  ;;  %p2036_p11 = scmp.ne.s32.totalorder %s1515_s13, %s2035_s14  ;;  %p2041_p13 = scmp.lt.s32.totalorder %s2035_s14, %s2035_s14 }
 0x24e   :  { %v1215_v38 = vadd.f32 %v1209_v4, %v1200_v7  ;;  %v1216_v40 = vadd.f32 %v1210_v62, %v1201_v57 }
 0x24f   :  { %1460 = vmatprep.mubr.bf16.mxu0 %v1233_v11  ;;  %p2042_p0 = por %p2041_p13, %p2040_p12 }
 0x250   :  { %v1230_v13 = vadd.f32 %v1224_v9, %v1215_v38  ;;  %1461 = vmatmul.mubr.bf16.vlgmr.msra.gmra.mxu0 %v1232_v5  ;;  %v1231_v43 = vadd.f32 %v1225_v12, %v1216_v40 }
 0x251   :  { %p2043_p1 = pnand %p2042_p0, %p2036_p11 }
 0x252   :  { %v1234_v14 = vpack.c.bf16 %v1230_v13, %v1230_v13  ;;  %v1235_v22 = vpack.c.bf16 %v1231_v43, %v1231_v43 }
 0x254   :  { %1470 = vmatprep.mubr.bf16.mxu1 %v1235_v22 }
 0x255   :  { %1471 = vmatmul.mubr.bf16.vlgmr.msra.gmra.mxu1 %v1234_v14 }
 0x310   :  { %v1462_v56 = vpop.f32.mrf.mxu0 }
 0x311   :  { %v1479_v45 = vadd.f32 %v1462_v56, %v2236_v0 }
 0x312   :  { %v1464_v21 = vpop.f32.mrf.mxu0 }
 0x313   :  { %v1497_v48 = vadd.f32 %v1490_v32, %v1479_v45  ;;  %v1480_v1 = vadd.f32 %v1464_v21, %v2241_v10 }
 0x314   :  { %v1466_v19 = vpop.f32.mrf.mxu0 }
 0x315   :  { %1503 = vst [vmem:[#allocation11] sm:$0xff] %v1497_v48  ;;  %v1498_v46 = vadd.f32 %v1494_v42, %v1480_v1  ;;  %v1481_v44 = vadd.f32 %v1466_v19, %v2244_v17  ;;  %v1472_v15 = vpop.f32.mrf.mxu1 }
 0x316   :  { %v1483_v2 = vadd.f32 %v1472_v15, %v2256_v33  ;;  %v1468_v47 = vpop.f32.mrf.mxu0 }
 0x317   :  { %1504 = vst [vmem:[#allocation11 + $0x8] sm:$0xff] %v1498_v46  ;;  %v1499_v60 = vadd.f32 %v1490_v32, %v1481_v44  ;;  %v1482_v53 = vadd.f32 %v1468_v47, %v2367_v39  ;;  %v1474_v0 = vpop.f32.mrf.mxu1 }
 0x318   :  { %v1501_v61 = vadd.f32 %v1490_v32, %v1483_v2  ;;  %v1484_v34 = vadd.f32 %v1474_v0, %v2368_v8 }
 0x319   :  { %1505 = vst [vmem:[#allocation11 + $0x10] sm:$0xff] %v1499_v60  ;;  %v1500_v10 = vadd.f32 %v1494_v42, %v1482_v53  ;;  %v1476_v58 = vpop.f32.mrf.mxu1 }
 0x31a   :  { %1507 = vst [vmem:[#allocation11 + $0x20] sm:$0xff] %v1501_v61  ;;  %v1502_v63 = vadd.f32 %v1494_v42, %v1484_v34 }
 0x31b   :  { %1506 = vst [vmem:[#allocation11 + $0x18] sm:$0xff] %v1500_v10  ;;  %v1477_v17 = vpop.f32.mrf.mxu1 }
 0x31c   :  { %1508 = vst [vmem:[#allocation11 + $0x28] sm:$0xff] %v1502_v63 }
 0x31d   :  { %2046 = shalt.err (!%p2043_p1)
}
 0x31e   :  { %1520 = dma.vmem_to_hbm [thread:$0]  %s1515_s13, 768, %s2364_s8, [#allocation4], %s2068_s17, %s2068_s17, %s2069_s18  }
 0x31f   :  { %2061 = dma.done.wait [#allocation4], 768  }
 0x320   :  { %2062 = vsyncadd [#allocation4], 4294966528 }
 0x321   :  { %1524 = vsyncpa [#allocation3], 1 }
 0x322   :  { %1525 = vsyncpa [#allocation6], 1 }
 0x323   :  { %1526 = vsyncpa [#allocation9], 1 }
 0x324   :  { %1527 = vsyncpa [#allocation4], 1 }

</bundles_post_ra>
